<compile_context>
chip_gen: v6e
topology: v6e:2x2x1
jax: 0.10.0
libtpu: 0.0.40
codegen_flags: <defaults>
</compile_context>

<pallas_src>
import jax
import jax.numpy as jnp
from jax import lax
from jax.experimental import pallas as pl
from jax.experimental.pallas import tpu as pltpu


def _round_up(x, m):
    return ((x + m - 1) // m) * m


# ----------------------------------------------------------------------------
# One-time, parameter-only precompute (hoisted out of the hot path).
# ----------------------------------------------------------------------------
def stl_init(embed, w_query, w_key, w_value):
    """Precompute the batch-independent operands of STL.

    embed:   [T, H]          style-token embedding
    w_query: [H, d_q]        torch-layout Linear weight (out, in), bias=False
    w_key:   [H, H]          torch-layout
    w_value: [H, H]          torch-layout

    Returns:
      a_scaled: [d_q, T]  =  (Wq^T @ K^T) / sqrt(key_dim)   with K = tanh(embed) @ Wk^T
      v:        [T, H]    =  tanh(embed) @ Wv^T
    """
    embed = jnp.asarray(embed, jnp.float32)
    wq = jnp.asarray(w_query, jnp.float32)
    wk = jnp.asarray(w_key, jnp.float32)
    wv = jnp.asarray(w_value, jnp.float32)
    T, H = embed.shape
    key_dim = H  # n_hidden // num_heads with num_heads == 1 (matches the module)

    keys_soft = jnp.tanh(embed)                                   # [T, H]

    # Fused K/V projection: one matmul against the stacked [2H, H] weight.
    w_kv = jnp.concatenate([wk, wv], axis=0)                      # [2H, H]
    kv = lax.dot_general(keys_soft, w_kv,
                         dimension_numbers=(((1,), (1,)), ((), ())),
                         preferred_element_type=jnp.float32)      # [T, 2H]
    k, v = kv[:, :H], kv[:, H:]                                   # [T, H] each

    # A = Wq^T @ K^T  (contract over H); the 1/sqrt(key_dim) scale is folded
    # in so the hot kernel needs no extra VPU multiply.
    a = lax.dot_general(wq, k,
                        dimension_numbers=(((0,), (1,)), ((), ())),
                        preferred_element_type=jnp.float32)       # [d_q, T]
    a_scaled = a * (1.0 / jnp.sqrt(jnp.float32(key_dim)))
    return a_scaled, v


# ----------------------------------------------------------------------------
# Hot-path Pallas kernel: scores = x @ A ; softmax ; out = attn @ V
# ----------------------------------------------------------------------------
def _stl_attn_kernel(x_ref, a_ref, v_ref, o_ref):
    # x_ref: [bn, d_q]   a_ref: [d_q, T]   v_ref: [T, H]   o_ref: [bn, H]
    scores = jnp.dot(x_ref[...], a_ref[...],
                     preferred_element_type=jnp.float32)          # [bn, T] f32
    m = jnp.max(scores, axis=-1, keepdims=True)
    e = jnp.exp(scores - m)
    denom = jnp.sum(e, axis=-1, keepdims=True)                    # >= 1
    attn = e / denom          # exact divide: off critical path (mem-bound)
    out = jnp.dot(attn, v_ref[...], preferred_element_type=jnp.float32)
    o_ref[...] = out.astype(o_ref.dtype)


def _stl_small_jax(x, a_scaled, v, out_dtype):
    """Tiny-batch fast path: two small matmuls + softmax, fused by XLA."""
    scores = jnp.dot(x.astype(jnp.float32), a_scaled,
                     preferred_element_type=jnp.float32)
    attn = jax.nn.softmax(scores, axis=-1)
    out = jnp.dot(attn, v, preferred_element_type=jnp.float32)
    return out.astype(out_dtype)[:, None, :]


def stl_apply(x, a_scaled, v, *, block_n=8192, min_pallas_batch=256):
    """Hot path: x [N, d_q] -> [N, 1, H] using precomputed (a_scaled, v).

    Output dtype follows x: supply bf16 x to halve HBM traffic of the
    dominant x/out streams (all internal softmax math stays f32).
    """
    x = jnp.asarray(x)
    N, d_q = x.shape
    T, H = v.shape
    out_dtype = x.dtype

    # Small-N dispatch: for the module's native batches a pallas_call launch
    # plus one grid step dwarfs the ~2-vreg payload; let XLA fuse it instead.
    if N < min_pallas_batch:
        return _stl_small_jax(x, a_scaled, v, out_dtype)

    # Large, sublane-aligned batch block (amortizes ~0.35 us per grid step).
    bn = max(8, min(block_n, _round_up(N, 8)))
    # v7x megacore: keep at least 2 grid steps when N is large so the
    # "parallel" batch axis can shard across both TensorCores.
    if N > 4096:
        bn = min(bn, _round_up(pl.cdiv(N, 2), 8))
    grid = (pl.cdiv(N, bn),)   # partial tail block handled by Pallas masking

    itemsize = jnp.dtype(x.dtype).itemsize
    flops = 2 * N * d_q * T + 2 * N * T * H
    bytes_accessed = (itemsize * N * d_q + 4 * (d_q * T + T * H)
                      + jnp.dtype(out_dtype).itemsize * N * H)

    out2d = pl.pallas_call(
        _stl_attn_kernel,
        out_shape=jax.ShapeDtypeStruct((N, H), out_dtype),
        grid_spec=pltpu.PrefetchScalarGridSpec(
            num_scalar_prefetch=0,
            grid=grid,
            in_specs=[
                pl.BlockSpec((bn, d_q), lambda i: (i, 0)),   # pipelined over N
                pl.BlockSpec((d_q, T), lambda i: (0, 0)),    # resident (f32, tiny)
                pl.BlockSpec((T, H), lambda i: (0, 0)),      # resident (f32, tiny)
            ],
            out_specs=pl.BlockSpec((bn, H), lambda i: (i, 0)),
        ),
        compiler_params=pltpu.CompilerParams(
            dimension_semantics=("parallel",),
            # Headroom above v5e's 16 MiB scoped default; fits v7x's 64 MiB.
            vmem_limit_bytes=32 * 1024 * 1024),
        cost_estimate=pl.CostEstimate(
            flops=flops,
            transcendentals=N * T,
            bytes_accessed=bytes_accessed),
    )(x, a_scaled, v)

    return out2d[:, None, :]  # [N, 1, H], matches PyTorch STL output


def stl_forward(x, embed, w_query, w_key, w_value):
    """Convenience wrapper: precompute + apply.  Returns [N, 1, H]."""
    a_scaled, v = stl_init(embed, w_query, w_key, w_value)
    return stl_apply(x, a_scaled, v)


# ----------------------------------------------------------------------------
# Pure-JAX reference (mirrors StyleEmbedAttention with num_heads = 1).
# ----------------------------------------------------------------------------
def _reference(x, embed, w_query, w_key, w_value):
    H = embed.shape[1]
    keys_soft = jnp.tanh(embed)                           # [T, H]
    q = x @ w_query.T                                     # [N, d_q] @ [d_q, H]? (torch layout below)
    k = keys_soft @ w_key.T                               # [T, H]
    v = keys_soft @ w_value.T                             # [T, H]
    scores = (q @ k.T) / jnp.sqrt(jnp.float32(H))         # [N, T]
    attn = jax.nn.softmax(scores, axis=-1)
    out = attn @ v                                        # [N, H]
    return out[:, None, :]


if __name__ == "__main__":
    # Module-consistent small shapes: n_hidden=32, token_num=32, batch=2.
    N = 2
    n_hidden = 32          # H
    token_num = 32         # T
    d_q = n_hidden // 2    # query dim = n_hidden // 2

    key = jax.random.PRNGKey(0)
    k_x, k_e, k_q, k_k, k_v, k_big = jax.random.split(key, 6)

    x = jax.random.normal(k_x, (N, d_q), dtype=jnp.float32)
    # embed ~ Normal(0, 0.5) as in torch.nn.init.normal_(..., std=0.5)
    embed = 0.5 * jax.random.normal(k_e, (token_num, n_hidden), dtype=jnp.float32)
    # Linear weights in torch layout [out_features, in_features], bias=False.
    w_query = 0.1 * jax.random.normal(k_q, (n_hidden, d_q), dtype=jnp.float32)
    w_key = 0.1 * jax.random.normal(k_k, (n_hidden, n_hidden), dtype=jnp.float32)
    w_value = 0.1 * jax.random.normal(k_v, (n_hidden, n_hidden), dtype=jnp.float32)

    # Precompute once (parameter-only).
    a_scaled, v_pre = stl_init(embed, w_query, w_key, w_value)

    # 1) Module-native tiny batch (N=2): dispatched to the fused JAX path.
    out_small = jax.block_until_ready(stl_apply(x, a_scaled, v_pre))
    ref_small = _reference(x, embed, w_query, w_key, w_value)
    assert out_small.shape == (N, 1, n_hidden), out_small.shape
    assert jnp.allclose(out_small, ref_small, atol=2e-3, rtol=2e-3), \
        "small-batch mismatch vs reference"

    # 2) Serving-scale batch: exercises the Pallas kernel with a multi-step
    #    "parallel" grid and a partial (boundary-masked) tail block.
    N_big = 1032
    x_big = jax.random.normal(k_big, (N_big, d_q), dtype=jnp.float32)
    out_big = jax.block_until_ready(stl_apply(x_big, a_scaled, v_pre, block_n=512))
    ref_big = _reference(x_big, embed, w_query, w_key, w_value)
    assert out_big.shape == (N_big, 1, n_hidden), out_big.shape
    assert jnp.allclose(out_big, ref_big, atol=2e-3, rtol=2e-3), \
        "large-batch mismatch vs reference"

    # 3) bf16 I/O path (halves x/out HBM traffic); compare against a reference
    #    fed the same bf16-quantized x, with bf16-appropriate tolerance.
    x_bf16 = x_big.astype(jnp.bfloat16)
    out_bf16 = jax.block_until_ready(stl_apply(x_bf16, a_scaled, v_pre, block_n=512))
    ref_bf16 = _reference(x_bf16.astype(jnp.float32), embed, w_query, w_key, w_value)
    assert out_bf16.dtype == jnp.bfloat16
    assert jnp.allclose(out_bf16.astype(jnp.float32), ref_bf16,
                        atol=2e-2, rtol=2e-2), "bf16 mismatch vs reference"

    print("KERNEL_OK")
</pallas_src>

<mosaic_0001>
module attributes {stable_mosaic.version = 11 : i64} {
  func.func @_stl_attn_kernel(%arg0: i32, %arg1: memref<512x16xf32, #tpu.memory_space<vmem>>, %arg2: memref<16x32xf32, #tpu.memory_space<vmem>>, %arg3: memref<32x32xf32, #tpu.memory_space<vmem>>, %arg4: memref<512x32xf32, #tpu.memory_space<vmem>>) attributes {dimension_semantics = [#tpu.dimension_semantics<parallel>], iteration_bounds = array<i64: 3>, scalar_prefetch = 0 : i64, scratch_operands = 0 : i64, tpu.core_type = #tpu.core_type<tc>, window_params = [{transform_indices = @transform_0, window_bounds = array<i64: 512, 16>}, {pipeline_mode = #tpu.pipeline_mode<synchronous>, transform_indices = @transform_1, window_bounds = array<i64: 16, 32>}, {pipeline_mode = #tpu.pipeline_mode<synchronous>, transform_indices = @transform_2, window_bounds = array<i64: 32, 32>}, {transform_indices = @transform_3, window_bounds = array<i64: 512, 32>}]} {
    %c0 = arith.constant 0 : index
    %c0_0 = arith.constant 0 : index
    %0 = vector.load %arg1[%c0, %c0_0] : memref<512x16xf32, #tpu.memory_space<vmem>>, vector<512x16xf32>
    %c0_1 = arith.constant 0 : index
    %c0_2 = arith.constant 0 : index
    %1 = vector.load %arg2[%c0_1, %c0_2] : memref<16x32xf32, #tpu.memory_space<vmem>>, vector<16x32xf32>
    %cst = arith.constant dense<0.000000e+00> : vector<512x32xf32>
    %2 = tpu.matmul %0, %1, %cst {dimension_numbers = #tpu.dot_dimension_numbers<[1], [0], [0], [1], [0, 0, 1, 1], [], []>} : vector<512x16xf32>, vector<16x32xf32>, vector<512x32xf32> -> vector<512x32xf32>
    %cst_3 = arith.constant dense<0xFF800000> : vector<512xf32>
    %3 = vector.multi_reduction <maximumf>, %2, %cst_3 [1] : vector<512x32xf32> to vector<512xf32>
    %4 = vector.shape_cast %3 : vector<512xf32> to vector<512x1xf32>
    %5 = vector.broadcast %4 : vector<512x1xf32> to vector<512x32xf32>
    %6 = arith.subf %2, %5 : vector<512x32xf32>
    %7 = math.exp %6 : vector<512x32xf32>
    %cst_4 = arith.constant dense<0.000000e+00> : vector<512xf32>
    %8 = vector.multi_reduction <add>, %7, %cst_4 [1] : vector<512x32xf32> to vector<512xf32>
    %9 = vector.shape_cast %8 : vector<512xf32> to vector<512x1xf32>
    %10 = vector.broadcast %9 : vector<512x1xf32> to vector<512x32xf32>
    %11 = arith.divf %7, %10 : vector<512x32xf32>
    %c0_5 = arith.constant 0 : index
    %c0_6 = arith.constant 0 : index
    %12 = vector.load %arg3[%c0_5, %c0_6] : memref<32x32xf32, #tpu.memory_space<vmem>>, vector<32x32xf32>
    %cst_7 = arith.constant dense<0.000000e+00> : vector<512x32xf32>
    %13 = tpu.matmul %11, %12, %cst_7 {dimension_numbers = #tpu.dot_dimension_numbers<[1], [0], [0], [1], [0, 0, 1, 1], [], []>} : vector<512x32xf32>, vector<32x32xf32>, vector<512x32xf32> -> vector<512x32xf32>
    %c0_8 = arith.constant 0 : index
    %c0_9 = arith.constant 0 : index
    %14 = vector.load %arg4[%c0_8, %c0_9] : memref<512x32xf32, #tpu.memory_space<vmem>>, vector<512x32xf32>
    tpu.vector_store %arg4[%c0_8, %c0_9], %13 {strides = array<i32>} : memref<512x32xf32, #tpu.memory_space<vmem>>, vector<512x32xf32>,
    return
  }
  func.func @transform_0(%arg0: i32) -> (i32, i32) {
    %c0_i32 = arith.constant 0 : i32
    %c0_i32_0 = arith.constant 0 : i32
    return %arg0, %c0_i32 : i32, i32
  }
  func.func @transform_1(%arg0: i32) -> (i32, i32) {
    %c0_i32 = arith.constant 0 : i32
    %c0_i32_0 = arith.constant 0 : i32
    %c0_i32_1 = arith.constant 0 : i32
    return %c0_i32, %c0_i32_0 : i32, i32
  }
  func.func @transform_2(%arg0: i32) -> (i32, i32) {
    %c0_i32 = arith.constant 0 : i32
    %c0_i32_0 = arith.constant 0 : i32
    %c0_i32_1 = arith.constant 0 : i32
    return %c0_i32, %c0_i32_0 : i32, i32
  }
  func.func @transform_3(%arg0: i32) -> (i32, i32) {
    %c0_i32 = arith.constant 0 : i32
    %c0_i32_0 = arith.constant 0 : i32
    return %arg0, %c0_i32 : i32, i32
  }
}

</mosaic_0001>

<bundles_post_ra>
// kernel: tpu_custom_call.1
= control target key start
LH: loop header
LB: loop body
LE: loop exit
PB: predicated region body
PF: predicated region fallthrough
CT: control target
= control target key end

     0   :  { %s3599_s12 = smov 0   ;;  %s3601_s13 = smov 0   ;;  %s4825_s0 = inlined_call_operand.vmem [shape: f32[1032,16], index: 0, kind: input, shape index: {}]   ;;  %s4826_s1 = inlined_call_operand.vmem [shape: f32[16,32], index: 1, kind: input, shape index: {}]   ;;  %s4827_s2 = inlined_call_operand.vmem [shape: f32[32,32], index: 2, kind: input, shape index: {}]   ;;  %s4828_s3 = inlined_call_operand.vmem [shape: f32[1032,32], index: 3, kind: output, shape index: {}]  }
   0x1   :  { %s3603_s14 = smov 0  }
   0x2 LB: > { %s3612_s15 = sadd.s32 4294967295, %s3545_s14   ;;  %s3614_s16 = sadd.s32 1, %s3545_s14   ;;  %s3545_s14 = sphi %s3603_s14, %s4918_s14   ;;  %s3541_s13 = sphi %s3601_s13, %s4917_s13   ;;  %s3537_s12 = sphi %s3599_s12, %s4916_s12  }
   0x3   : > { %s85_s17 = ssub.s32 %s3545_s14, %s3614_s16  ;;  %s88_s18 = sadd.s32 1, %s3541_s13 }
   0x4   : > { %p86_p0 = scmp.eq.s32.totalorder %s85_s17, 0  ;;  %p98_p1 = scmp.ne.s32.totalorder %s3541_s13, %s3537_s12 }
   0x5   : > { %p99_p2 = scmp.eq.s32.totalorder %s3612_s15, 2  ;;  %p2657_p3 = scmp.ge.s32.totalorder %s3545_s14, 1 }
   0x6   : > { %s3622_s19 = scalar_select %p86_p0, %s3541_s13, %s88_s18  }
   0x7   : > { %p3624_p4 = por %p99_p2, %p98_p1  ;;  %p146_p5 = scmp.lt.s32.totalorder %s3545_s14, 4 }
   0x9   : > { %p147_p6 = pnand %p2657_p3, %p146_p5 }
   0xb   : > { %150 = sbr.rel (%p147_p6) target bundleno = 920 (0x398), region = 32 }
  0x10   : > { %v257_v0 = vld [vmem:[%s4826_s1 + $0x8] sm:$0xff]  ;;  %v256_v1 = vld [vmem:[%s4826_s1] sm:$0xff]  ;;  %s3635_s25 = sshll.u32 %s3612_s15, 6  ;;  %vm258_vm0 = vcmask 130048   ;;  %vm836_vm1 = vcmask 261120   ;;  %s170_s14 = sand.u32 1, %s3537_s12  }
  0x11   : > { %2943 = vmatprep.subr.mxu0 %v257_v0  ;;  %p178_p7 = scmp.lt.s32.totalorder %s3635_s25, 128  ;;  %s2658_s17 = sshll.u32 %s170_s14, 9 }
  0x12   : > { %2944 = vmatpush3.msra.mxu0 %v257_v0  ;;  %s4489_s18 = scalar_lea.vmem [#allocation2], %s2658_s17   ;;  %s2194_s12 = ssub.s32 (%p3624_p4), 129, %s3635_s25 }
  0x13   : > { %2945 = vmatprep.subr.mxu0 %v256_v1  ;;  %s179_s26 = scalar_select %p178_p7, %s3635_s25, 128 }
  0x14   : > { %2946 = vmatpush3.msra.mxu0 %v256_v1  ;;  %s2806_s21 = sshll.u32 (%p3624_p4), %s3612_s15, 9  ;;  %p2195_p8 = scmp.lt.s32.totalorder (%p3624_p4), %s2194_s12, 64 }
  0x15   : > { %s2660_s27 = sshll.u32 %s179_s26, 3  ;;  %s4626_s24 = scalar_lea.vmem (%p3624_p4), %s4828_s3, %s2806_s21  }
  0x16   : > { %s3642_s30 = scalar_lea.vmem %s4825_s0, %s2660_s27 }
  0x17   : > { %v192_v2 = vld [vmem:[%s3642_s30] sm:$0xff]  ;;  %v193_v3 = vld [vmem:[%s3642_s30 + $0x8] sm:$0xff]  ;;  %v194_v4 = vld [vmem:[%s3642_s30 + $0x10] sm:$0xff] }
  0x18   : > { %2947 = vmatprep.mubr.msk.f32.mxu0 %vm258_vm0, %v192_v2  ;;  %v195_v5 = vld [vmem:[%s3642_s30 + $0x18] sm:$0xff]  ;;  %v196_v6 = vld [vmem:[%s3642_s30 + $0x20] sm:$0xff]  ;;  %v197_v7 = vld [vmem:[%s3642_s30 + $0x28] sm:$0xff] }
  0x19   : > { %2948 = vmatmul.mubr.msk.f32.vlgmr.msra.gmra.mxu0 %vm258_vm0, %v193_v3  ;;  %v198_v8 = vld [vmem:[%s3642_s30 + $0x30] sm:$0xff]  ;;  %v199_v9 = vld [vmem:[%s3642_s30 + $0x38] sm:$0xff]  ;;  %v200_v10 = vld [vmem:[%s3642_s30 + $0x40] sm:$0xff] }
  0x1a   : > { %2950 = vmatprep.mubr.msk.f32.mxu0 %vm258_vm0, %v194_v4  ;;  %v201_v11 = vld [vmem:[%s3642_s30 + $0x48] sm:$0xff]  ;;  %v202_v12 = vld [vmem:[%s3642_s30 + $0x50] sm:$0xff]  ;;  %v203_v13 = vld [vmem:[%s3642_s30 + $0x58] sm:$0xff] }
  0x1b   : > { %v204_v14 = vld [vmem:[%s3642_s30 + $0x60] sm:$0xff]  ;;  %v205_v15 = vld [vmem:[%s3642_s30 + $0x68] sm:$0xff]  ;;  %v206_v16 = vld [vmem:[%s3642_s30 + $0x70] sm:$0xff] }
  0x1c   : > { %v207_v17 = vld [vmem:[%s3642_s30 + $0x78] sm:$0xff]  ;;  %v208_v18 = vld [vmem:[%s3642_s30 + $0x80] sm:$0xff]  ;;  %v209_v19 = vld [vmem:[%s3642_s30 + $0x88] sm:$0xff] }
  0x1d   : > { %2951 = vmatmul.mubr.msk.f32.gmra.mxu0 %vm258_vm0, %v195_v5  ;;  %v210_v20 = vld [vmem:[%s3642_s30 + $0x90] sm:$0xff]  ;;  %v211_v21 = vld [vmem:[%s3642_s30 + $0x98] sm:$0xff]  ;;  %v212_v22 = vld [vmem:[%s3642_s30 + $0xa0] sm:$0xff] }
  0x1e   : > { %2953 = vmatprep.mubr.msk.f32.mxu0 %vm258_vm0, %v196_v6  ;;  %v213_v23 = vld [vmem:[%s3642_s30 + $0xa8] sm:$0xff]  ;;  %v214_v24 = vld [vmem:[%s3642_s30 + $0xb0] sm:$0xff]  ;;  %v215_v25 = vld [vmem:[%s3642_s30 + $0xb8] sm:$0xff] }
  0x1f   : > { %v216_v26 = vld [vmem:[%s3642_s30 + $0xc0] sm:$0xff]  ;;  %v217_v27 = vld [vmem:[%s3642_s30 + $0xc8] sm:$0xff]  ;;  %v218_v28 = vld [vmem:[%s3642_s30 + $0xd0] sm:$0xff] }
  0x20   : > { %v219_v29 = vld [vmem:[%s3642_s30 + $0xd8] sm:$0xff]  ;;  %v220_v30 = vld [vmem:[%s3642_s30 + $0xe0] sm:$0xff]  ;;  %v221_v31 = vld [vmem:[%s3642_s30 + $0xe8] sm:$0xff] }
  0x21   : > { %2954 = vmatmul.mubr.msk.f32.gmra.mxu0 %vm258_vm0, %v197_v7  ;;  %v222_v32 = vld [vmem:[%s3642_s30 + $0xf0] sm:$0xff]  ;;  %v223_v33 = vld [vmem:[%s3642_s30 + $0xf8] sm:$0xff]  ;;  %v224_v34 = vld [vmem:[%s3642_s30 + $0x100] sm:$0xff] }
  0x22   : > { %2956 = vmatprep.mubr.msk.f32.mxu0 %vm258_vm0, %v198_v8  ;;  %v225_v35 = vld [vmem:[%s3642_s30 + $0x108] sm:$0xff]  ;;  %v226_v36 = vld [vmem:[%s3642_s30 + $0x110] sm:$0xff]  ;;  %v227_v37 = vld [vmem:[%s3642_s30 + $0x118] sm:$0xff] }
  0x23   : > { %v228_v38 = vld [vmem:[%s3642_s30 + $0x120] sm:$0xff]  ;;  %v229_v39 = vld [vmem:[%s3642_s30 + $0x128] sm:$0xff]  ;;  %v230_v40 = vld [vmem:[%s3642_s30 + $0x130] sm:$0xff] }
  0x24   : > { %v231_v41 = vld [vmem:[%s3642_s30 + $0x138] sm:$0xff]  ;;  %v232_v42 = vld [vmem:[%s3642_s30 + $0x140] sm:$0xff]  ;;  %v233_v43 = vld [vmem:[%s3642_s30 + $0x148] sm:$0xff] }
  0x25   : > { %2957 = vmatmul.mubr.msk.f32.gmra.mxu0 %vm258_vm0, %v199_v9  ;;  %v234_v44 = vld [vmem:[%s3642_s30 + $0x150] sm:$0xff]  ;;  %v235_v45 = vld [vmem:[%s3642_s30 + $0x158] sm:$0xff]  ;;  %v236_v46 = vld [vmem:[%s3642_s30 + $0x160] sm:$0xff] }
  0x26   : > { %2959 = vmatprep.mubr.msk.f32.mxu0 %vm258_vm0, %v200_v10  ;;  %v237_v47 = vld [vmem:[%s3642_s30 + $0x168] sm:$0xff]  ;;  %v238_v48 = vld [vmem:[%s3642_s30 + $0x170] sm:$0xff]  ;;  %v239_v49 = vld [vmem:[%s3642_s30 + $0x178] sm:$0xff] }
  0x27   : > { %v240_v50 = vld [vmem:[%s3642_s30 + $0x180] sm:$0xff]  ;;  %v241_v51 = vld [vmem:[%s3642_s30 + $0x188] sm:$0xff]  ;;  %v242_v52 = vld [vmem:[%s3642_s30 + $0x190] sm:$0xff] }
  0x28   : > { %v243_v53 = vld [vmem:[%s3642_s30 + $0x198] sm:$0xff]  ;;  %v244_v54 = vld [vmem:[%s3642_s30 + $0x1a0] sm:$0xff]  ;;  %v245_v55 = vld [vmem:[%s3642_s30 + $0x1a8] sm:$0xff] }
  0x29   : > { %2960 = vmatmul.mubr.msk.f32.gmra.mxu0 %vm258_vm0, %v201_v11  ;;  %v246_v56 = vld [vmem:[%s3642_s30 + $0x1b0] sm:$0xff]  ;;  %v247_v57 = vld [vmem:[%s3642_s30 + $0x1b8] sm:$0xff]  ;;  %v248_v58 = vld [vmem:[%s3642_s30 + $0x1c0] sm:$0xff] }
  0x2a   : > { %2962 = vmatprep.mubr.msk.f32.mxu0 %vm258_vm0, %v202_v12  ;;  %v249_v59 = vld [vmem:[%s3642_s30 + $0x1c8] sm:$0xff]  ;;  %v250_v60 = vld [vmem:[%s3642_s30 + $0x1d0] sm:$0xff]  ;;  %v251_v61 = vld [vmem:[%s3642_s30 + $0x1d8] sm:$0xff] }
  0x2b   : > { %v252_v62 = vld [vmem:[%s3642_s30 + $0x1e0] sm:$0xff]  ;;  %v253_v63 = vld [vmem:[%s3642_s30 + $0x1e8] sm:$0xff]  ;;  %v254_v0 = vld [vmem:[%s3642_s30 + $0x1f0] sm:$0xff] }
  0x2c   : > { %v255_v1 = vld [vmem:[%s3642_s30 + $0x1f8] sm:$0xff] }
  0x2d   : > { %2963 = vmatmul.mubr.msk.f32.gmra.mxu0 %vm258_vm0, %v203_v13 }
  0x2e   : > { %2965 = vmatprep.mubr.msk.f32.mxu0 %vm258_vm0, %v204_v14 }
  0x31   : > { %2966 = vmatmul.mubr.msk.f32.gmra.mxu0 %vm258_vm0, %v205_v15 }
  0x32   : > { %2968 = vmatprep.mubr.msk.f32.mxu0 %vm258_vm0, %v206_v16 }
  0x35   : > { %2969 = vmatmul.mubr.msk.f32.gmra.mxu0 %vm258_vm0, %v207_v17 }
  0x36   : > { %2971 = vmatprep.mubr.msk.f32.mxu0 %vm258_vm0, %v208_v18 }
  0x39   : > { %2972 = vmatmul.mubr.msk.f32.gmra.mxu0 %vm258_vm0, %v209_v19 }
  0x3a   : > { %2974 = vmatprep.mubr.msk.f32.mxu0 %vm258_vm0, %v210_v20 }
  0x3d   : > { %2975 = vmatmul.mubr.msk.f32.gmra.mxu0 %vm258_vm0, %v211_v21 }
  0x3e   : > { %2977 = vmatprep.mubr.msk.f32.mxu0 %vm258_vm0, %v212_v22 }
  0x41   : > { %2978 = vmatmul.mubr.msk.f32.gmra.mxu0 %vm258_vm0, %v213_v23 }
  0x42   : > { %2980 = vmatprep.mubr.msk.f32.mxu0 %vm258_vm0, %v214_v24 }
  0x45   : > { %2981 = vmatmul.mubr.msk.f32.gmra.mxu0 %vm258_vm0, %v215_v25 }
  0x46   : > { %2983 = vmatprep.mubr.msk.f32.mxu0 %vm258_vm0, %v216_v26 }
  0x49   : > { %2984 = vmatmul.mubr.msk.f32.gmra.mxu0 %vm258_vm0, %v217_v27 }
  0x4a   : > { %2986 = vmatprep.mubr.msk.f32.mxu0 %vm258_vm0, %v218_v28 }
  0x4d   : > { %2987 = vmatmul.mubr.msk.f32.gmra.mxu0 %vm258_vm0, %v219_v29 }
  0x4e   : > { %2989 = vmatprep.mubr.msk.f32.mxu0 %vm258_vm0, %v220_v30 }
  0x51   : > { %2990 = vmatmul.mubr.msk.f32.gmra.mxu0 %vm258_vm0, %v221_v31 }
  0x52   : > { %2992 = vmatprep.mubr.msk.f32.mxu0 %vm258_vm0, %v222_v32 }
  0x55   : > { %2993 = vmatmul.mubr.msk.f32.gmra.mxu0 %vm258_vm0, %v223_v33 }
  0x56   : > { %2995 = vmatprep.mubr.msk.f32.mxu0 %vm258_vm0, %v224_v34 }
  0x59   : > { %2996 = vmatmul.mubr.msk.f32.gmra.mxu0 %vm258_vm0, %v225_v35 }
  0x5a   : > { %2998 = vmatprep.mubr.msk.f32.mxu0 %vm258_vm0, %v226_v36 }
  0x5d   : > { %2999 = vmatmul.mubr.msk.f32.gmra.mxu0 %vm258_vm0, %v227_v37 }
  0x5e   : > { %3001 = vmatprep.mubr.msk.f32.mxu0 %vm258_vm0, %v228_v38 }
  0x61   : > { %3002 = vmatmul.mubr.msk.f32.gmra.mxu0 %vm258_vm0, %v229_v39 }
  0x62   : > { %3004 = vmatprep.mubr.msk.f32.mxu0 %vm258_vm0, %v230_v40 }
  0x65   : > { %3005 = vmatmul.mubr.msk.f32.gmra.mxu0 %vm258_vm0, %v231_v41 }
  0x66   : > { %3007 = vmatprep.mubr.msk.f32.mxu0 %vm258_vm0, %v232_v42 }
  0x69   : > { %3008 = vmatmul.mubr.msk.f32.gmra.mxu0 %vm258_vm0, %v233_v43 }
  0x6a   : > { %3010 = vmatprep.mubr.msk.f32.mxu0 %vm258_vm0, %v234_v44 }
  0x6d   : > { %3011 = vmatmul.mubr.msk.f32.gmra.mxu0 %vm258_vm0, %v235_v45 }
  0x6e   : > { %3013 = vmatprep.mubr.msk.f32.mxu0 %vm258_vm0, %v236_v46 }
  0x71   : > { %3014 = vmatmul.mubr.msk.f32.gmra.mxu0 %vm258_vm0, %v237_v47 }
  0x72   : > { %3016 = vmatprep.mubr.msk.f32.mxu0 %vm258_vm0, %v238_v48 }
  0x75   : > { %3017 = vmatmul.mubr.msk.f32.gmra.mxu0 %vm258_vm0, %v239_v49 }
  0x76   : > { %3019 = vmatprep.mubr.msk.f32.mxu0 %vm258_vm0, %v240_v50 }
  0x79   : > { %3020 = vmatmul.mubr.msk.f32.gmra.mxu0 %vm258_vm0, %v241_v51 }
  0x7a   : > { %3022 = vmatprep.mubr.msk.f32.mxu0 %vm258_vm0, %v242_v52 }
  0x7d   : > { %3023 = vmatmul.mubr.msk.f32.gmra.mxu0 %vm258_vm0, %v243_v53 }
  0x7e   : > { %3025 = vmatprep.mubr.msk.f32.mxu0 %vm258_vm0, %v244_v54 }
  0x81   : > { %3026 = vmatmul.mubr.msk.f32.gmra.mxu0 %vm258_vm0, %v245_v55 }
  0x82   : > { %3028 = vmatprep.mubr.msk.f32.mxu0 %vm258_vm0, %v246_v56 }
  0x85   : > { %3029 = vmatmul.mubr.msk.f32.gmra.mxu0 %vm258_vm0, %v247_v57 }
  0x86   : > { %3031 = vmatprep.mubr.msk.f32.mxu0 %vm258_vm0, %v248_v58 }
  0x89   : > { %3032 = vmatmul.mubr.msk.f32.gmra.mxu0 %vm258_vm0, %v249_v59 }
  0x8a   : > { %3034 = vmatprep.mubr.msk.f32.mxu0 %vm258_vm0, %v250_v60 }
  0x8d   : > { %3035 = vmatmul.mubr.msk.f32.gmra.mxu0 %vm258_vm0, %v251_v61 }
  0x8e   : > { %3037 = vmatprep.mubr.msk.f32.mxu0 %vm258_vm0, %v252_v62 }
  0x91   : > { %3038 = vmatmul.mubr.msk.f32.gmra.mxu0 %vm258_vm0, %v253_v63 }
  0x92   : > { %3040 = vmatprep.mubr.msk.f32.mxu0 %vm258_vm0, %v254_v0 }
  0x95   : > { %3041 = vmatmul.mubr.msk.f32.gmra.mxu0 %vm258_vm0, %v255_v1 }
  0xd9   : > { %v3772_v2 = vpop.f32.mrf.mxu0 }
  0xda   : > { %v840_v3 = vsel %vm836_vm1, %v3772_v2, -inf }
  0xdb   : > { %841 = vmax.xlane.f32.xlu0 %v840_v3  ;;  %v3776_v4 = vpop.f32.mrf.mxu0 }
  0xdc   : > { %v837_v6 = vsel %vm836_vm1, %v3776_v4, -inf }
  0xdd   : > { %v3778_v5 = vpop.f32.mrf.mxu0 }
  0xde   : > { %v846_v7 = vsel %vm836_vm1, %v3778_v5, -inf }
  0xdf   : > { %838 = vmax.xlane.f32.xlu0 %v837_v6  ;;  %847 = vmax.xlane.f32.xlu1 %v846_v7  ;;  %v3784_v8 = vpop.f32.mrf.mxu0 }
  0xe0   : > { %v843_v10 = vsel %vm836_vm1, %v3784_v8, -inf }
  0xe1   : > { %v3786_v9 = vpop.f32.mrf.mxu0 }
  0xe2   : > { %v852_v14 = vsel %vm836_vm1, %v3786_v9, -inf }
  0xe3   : > { %844 = vmax.xlane.f32.xlu1 %v843_v10  ;;  %v3790_v11 = vpop.f32.mrf.mxu0 }
  0xe4   : > { %v849_v12 = vsel %vm836_vm1, %v3790_v11, -inf }
  0xe5   : > { %850 = vmax.xlane.f32.xlu0 %v849_v12  ;;  %v3794_v13 = vpop.f32.mrf.mxu0 }
  0xe6   : > { %v858_v18 = vsel %vm836_vm1, %v3794_v13, -inf }
  0xe7   : > { %853 = vmax.xlane.f32.xlu1 %v852_v14  ;;  %v3798_v15 = vpop.f32.mrf.mxu0 }
  0xe8   : > { %v855_v16 = vsel %vm836_vm1, %v3798_v15, -inf }
  0xe9   : > { %856 = vmax.xlane.f32.xlu0 %v855_v16  ;;  %v3802_v17 = vpop.f32.mrf.mxu0 }
  0xea   : > { %v864_v22 = vsel %vm836_vm1, %v3802_v17, -inf }
  0xeb   : > { %859 = vmax.xlane.f32.xlu1 %v858_v18  ;;  %v3806_v19 = vpop.f32.mrf.mxu0 }
  0xec   : > { %v861_v20 = vsel %vm836_vm1, %v3806_v19, -inf }
  0xed   : > { %862 = vmax.xlane.f32.xlu0 %v861_v20  ;;  %v3810_v21 = vpop.f32.mrf.mxu0 }
  0xee   : > { %v870_v26 = vsel %vm836_vm1, %v3810_v21, -inf }
  0xef   : > { %865 = vmax.xlane.f32.xlu1 %v864_v22  ;;  %v3814_v23 = vpop.f32.mrf.mxu0 }
  0xf0   : > { %v867_v24 = vsel %vm836_vm1, %v3814_v23, -inf }
  0xf1   : > { %868 = vmax.xlane.f32.xlu0 %v867_v24  ;;  %v3818_v25 = vpop.f32.mrf.mxu0 }
  0xf2   : > { %v876_v30 = vsel %vm836_vm1, %v3818_v25, -inf }
  0xf3   : > { %871 = vmax.xlane.f32.xlu1 %v870_v26  ;;  %v3822_v27 = vpop.f32.mrf.mxu0 }
  0xf4   : > { %v873_v28 = vsel %vm836_vm1, %v3822_v27, -inf }
  0xf5   : > { %874 = vmax.xlane.f32.xlu0 %v873_v28  ;;  %v3826_v29 = vpop.f32.mrf.mxu0 }
  0xf6   : > { %v882_v34 = vsel %vm836_vm1, %v3826_v29, -inf }
  0xf7   : > { %877 = vmax.xlane.f32.xlu1 %v876_v30  ;;  %v3830_v31 = vpop.f32.mrf.mxu0 }
  0xf8   : > { %v879_v32 = vsel %vm836_vm1, %v3830_v31, -inf }
  0xf9   : > { %880 = vmax.xlane.f32.xlu0 %v879_v32  ;;  %v3834_v33 = vpop.f32.mrf.mxu0 }
  0xfa   : > { %v888_v38 = vsel %vm836_vm1, %v3834_v33, -inf }
  0xfb   : > { %883 = vmax.xlane.f32.xlu1 %v882_v34  ;;  %v3838_v35 = vpop.f32.mrf.mxu0 }
  0xfc   : > { %v885_v36 = vsel %vm836_vm1, %v3838_v35, -inf }
  0xfd   : > { %886 = vmax.xlane.f32.xlu0 %v885_v36  ;;  %v3842_v37 = vpop.f32.mrf.mxu0 }
  0xfe   : > { %v894_v42 = vsel %vm836_vm1, %v3842_v37, -inf }
  0xff   : > { %889 = vmax.xlane.f32.xlu1 %v888_v38  ;;  %v3846_v39 = vpop.f32.mrf.mxu0 }
 0x100   : > { %v891_v40 = vsel %vm836_vm1, %v3846_v39, -inf }
 0x101   : > { %892 = vmax.xlane.f32.xlu0 %v891_v40  ;;  %v3850_v41 = vpop.f32.mrf.mxu0 }
 0x102   : > { %v900_v46 = vsel %vm836_vm1, %v3850_v41, -inf }
 0x103   : > { %895 = vmax.xlane.f32.xlu1 %v894_v42  ;;  %v3854_v43 = vpop.f32.mrf.mxu0 }
 0x104   : > { %v897_v44 = vsel %vm836_vm1, %v3854_v43, -inf }
 0x105   : > { %898 = vmax.xlane.f32.xlu0 %v897_v44  ;;  %v3858_v45 = vpop.f32.mrf.mxu0 }
 0x106   : > { %v906_v50 = vsel %vm836_vm1, %v3858_v45, -inf }
 0x107   : > { %901 = vmax.xlane.f32.xlu1 %v900_v46  ;;  %v3862_v47 = vpop.f32.mrf.mxu0 }
 0x108   : > { %v903_v48 = vsel %vm836_vm1, %v3862_v47, -inf }
 0x109   : > { %904 = vmax.xlane.f32.xlu0 %v903_v48  ;;  %v3866_v49 = vpop.f32.mrf.mxu0 }
 0x10a   : > { %v912_v54 = vsel %vm836_vm1, %v3866_v49, -inf }
 0x10b   : > { %907 = vmax.xlane.f32.xlu1 %v906_v50  ;;  %v3870_v51 = vpop.f32.mrf.mxu0 }
 0x10c   : > { %v909_v52 = vsel %vm836_vm1, %v3870_v51, -inf }
 0x10d   : > { %910 = vmax.xlane.f32.xlu0 %v909_v52  ;;  %v3874_v53 = vpop.f32.mrf.mxu0 }
 0x10e   : > { %v918_v58 = vsel %vm836_vm1, %v3874_v53, -inf }
 0x10f   : > { %913 = vmax.xlane.f32.xlu1 %v912_v54  ;;  %v3878_v55 = vpop.f32.mrf.mxu0 }
 0x110   : > { %v915_v56 = vsel %vm836_vm1, %v3878_v55, -inf }
 0x111   : > { %916 = vmax.xlane.f32.xlu0 %v915_v56  ;;  %v3882_v57 = vpop.f32.mrf.mxu0 }
 0x112   : > { %v924_v62 = vsel %vm836_vm1, %v3882_v57, -inf }
 0x113   : > { %919 = vmax.xlane.f32.xlu1 %v918_v58  ;;  %v3886_v59 = vpop.f32.mrf.mxu0 }
 0x114   : > { %v921_v60 = vsel %vm836_vm1, %v3886_v59, -inf }
 0x115   : > { %922 = vmax.xlane.f32.xlu0 %v921_v60  ;;  %v3890_v61 = vpop.f32.mrf.mxu0 }
 0x116   : > { %v930_v3 = vsel %vm836_vm1, %v3890_v61, -inf }
 0x117   : > { %925 = vmax.xlane.f32.xlu1 %v924_v62  ;;  %v3894_v63 = vpop.f32.mrf.mxu0 }
 0x118   : > { %v927_v0 = vsel %vm836_vm1, %v3894_v63, -inf }
 0x119   : > { %928 = vmax.xlane.f32.xlu0 %v927_v0  ;;  %v3898_v1 = vpop.f32.mrf.mxu0 }
 0x11a   : > { %v936_v12 = vsel %vm836_vm1, %v3898_v1, -inf }
 0x11b   : > { %931 = vmax.xlane.f32.xlu1 %v930_v3  ;;  %v3902_v6 = vpop.f32.mrf.mxu0 }
 0x11c   : > { %v933_v7 = vsel %vm836_vm1, %v3902_v6, -inf }
 0x11d   : > { %934 = vmax.xlane.f32.xlu0 %v933_v7  ;;  %v3906_v10 = vpop.f32.mrf.mxu0 }
 0x11e   : > { %v942_v20 = vsel %vm836_vm1, %v3906_v10, -inf }
 0x11f   : > { %937 = vmax.xlane.f32.xlu1 %v936_v12  ;;  %v3910_v14 = vpop.f32.mrf.mxu0 }
 0x120   : > { %v939_v16 = vsel %vm836_vm1, %v3910_v14, -inf }
 0x121   : > { %940 = vmax.xlane.f32.xlu0 %v939_v16  ;;  %v3914_v18 = vpop.f32.mrf.mxu0 }
 0x122   : > { %v948_v28 = vsel %vm836_vm1, %v3914_v18, -inf }
 0x123   : > { %943 = vmax.xlane.f32.xlu1 %v942_v20  ;;  %v3918_v22 = vpop.f32.mrf.mxu0 }
 0x124   : > { %v945_v24 = vsel %vm836_vm1, %v3918_v22, -inf }
 0x125   : > { %946 = vmax.xlane.f32.xlu0 %v945_v24  ;;  %v3922_v26 = vpop.f32.mrf.mxu0 }
 0x126   : > { %v954_v36 = vsel %vm836_vm1, %v3922_v26, -inf }
 0x127   : > { %949 = vmax.xlane.f32.xlu1 %v948_v28  ;;  %v3926_v30 = vpop.f32.mrf.mxu0 }
 0x128   : > { %v951_v32 = vsel %vm836_vm1, %v3926_v30, -inf }
 0x129   : > { %952 = vmax.xlane.f32.xlu0 %v951_v32  ;;  %v3930_v34 = vpop.f32.mrf.mxu0 }
 0x12a   : > { %v960_v44 = vsel %vm836_vm1, %v3930_v34, -inf }
 0x12b   : > { %955 = vmax.xlane.f32.xlu1 %v954_v36  ;;  %v3934_v38 = vpop.f32.mrf.mxu0 }
 0x12c   : > { %v957_v40 = vsel %vm836_vm1, %v3934_v38, -inf }
 0x12d   : > { %958 = vmax.xlane.f32.xlu0 %v957_v40  ;;  %v3938_v42 = vpop.f32.mrf.mxu0 }
 0x12e   : > { %v966_v52 = vsel %vm836_vm1, %v3938_v42, -inf }
 0x12f   : > { %961 = vmax.xlane.f32.xlu1 %v960_v44  ;;  %v3942_v46 = vpop.f32.mrf.mxu0 }
 0x130   : > { %v963_v48 = vsel %vm836_vm1, %v3942_v46, -inf }
 0x131   : > { %964 = vmax.xlane.f32.xlu0 %v963_v48  ;;  %v3946_v50 = vpop.f32.mrf.mxu0 }
 0x132   : > { %v972_v60 = vsel %vm836_vm1, %v3946_v50, -inf }
 0x133   : > { %967 = vmax.xlane.f32.xlu1 %v966_v52  ;;  %v3950_v54 = vpop.f32.mrf.mxu0 }
 0x134   : > { %v969_v56 = vsel %vm836_vm1, %v3950_v54, -inf }
 0x135   : > { %970 = vmax.xlane.f32.xlu0 %v969_v56  ;;  %v3954_v58 = vpop.f32.mrf.mxu0 }
 0x136   : > { %v978_v7 = vsel %vm836_vm1, %v3954_v58, -inf }
 0x137   : > { %973 = vmax.xlane.f32.xlu1 %v972_v60  ;;  %v3958_v62 = vpop.f32.mrf.mxu0 }
 0x138   : > { %v975_v0 = vsel %vm836_vm1, %v3958_v62, -inf }
 0x139   : > { %976 = vmax.xlane.f32.xlu0 %v975_v0  ;;  %v3962_v3 = vpop.f32.mrf.mxu0 }
 0x13a   : > { %v984_v24 = vsel %vm836_vm1, %v3962_v3, -inf }
 0x13b   : > { %979 = vmax.xlane.f32.xlu1 %v978_v7  ;;  %v3966_v12 = vpop.f32.mrf.mxu0 }
 0x13c   : > { %v981_v16 = vsel %vm836_vm1, %v3966_v12, -inf }
 0x13d   : > { %982 = vmax.xlane.f32.xlu0 %v981_v16  ;;  %v3970_v20 = vpop.f32.mrf.mxu0 }
 0x13e   : > { %4857 = vst [vmem:[#allocation3_spill] sm:$0xff] %v3970_v20  ;;  %v990_v40 = vsel %vm836_vm1, %v3970_v20, -inf }
 0x13f   : > { %985 = vmax.xlane.f32.xlu1 %v984_v24  ;;  %v3974_v28 = vpop.f32.mrf.mxu0 }
 0x140   : > { %4858 = vst [vmem:[#allocation4_spill] sm:$0xff] %v3974_v28  ;;  %v987_v32 = vsel %vm836_vm1, %v3974_v28, -inf }
 0x141   : > { %988 = vmax.xlane.f32.xlu0 %v987_v32  ;;  %v3978_v36 = vpop.f32.mrf.mxu0 }
 0x142   : > { %4859 = vst [vmem:[#allocation5_spill] sm:$0xff] %v3978_v36  ;;  %v996_v56 = vsel %vm836_vm1, %v3978_v36, -inf }
 0x143   : > { %991 = vmax.xlane.f32.xlu1 %v990_v40  ;;  %v3982_v44 = vpop.f32.mrf.mxu0 }
 0x144   : > { %4860 = vst [vmem:[#allocation6_spill] sm:$0xff] %v3982_v44  ;;  %v993_v48 = vsel %vm836_vm1, %v3982_v44, -inf }
 0x145   : > { %994 = vmax.xlane.f32.xlu0 %v993_v48  ;;  %v3986_v52 = vpop.f32.mrf.mxu0 }
 0x146   : > { %4861 = vst [vmem:[#allocation7_spill] sm:$0xff] %v3986_v52  ;;  %v1002_v16 = vsel %vm836_vm1, %v3986_v52, -inf }
 0x147   : > { %997 = vmax.xlane.f32.xlu1 %v996_v56  ;;  %v3990_v60 = vpop.f32.mrf.mxu0 }
 0x148   : > { %4862 = vst [vmem:[#allocation8_spill] sm:$0xff] %v3990_v60  ;;  %v999_v0 = vsel %vm836_vm1, %v3990_v60, -inf }
 0x149   : > { %1000 = vmax.xlane.f32.xlu0 %v999_v0  ;;  %v3994_v7 = vpop.f32.mrf.mxu0 }
 0x14a   : > { %4863 = vst [vmem:[#allocation9_spill] sm:$0xff] %v3994_v7  ;;  %v1008_v48 = vsel %vm836_vm1, %v3994_v7, -inf }
 0x14b   : > { %1003 = vmax.xlane.f32.xlu1 %v1002_v16  ;;  %v3998_v24 = vpop.f32.mrf.mxu0 }
 0x14c   : > { %4864 = vst [vmem:[#allocation10_spill] sm:$0xff] %v3998_v24  ;;  %v1005_v32 = vsel %vm836_vm1, %v3998_v24, -inf }
 0x14d   : > { %1006 = vmax.xlane.f32.xlu0 %v1005_v32  ;;  %v4002_v40 = vpop.f32.mrf.mxu0 }
 0x14e   : > { %4865 = vst [vmem:[#allocation11_spill] sm:$0xff] %v4002_v40  ;;  %v1014_v16 = vsel %vm836_vm1, %v4002_v40, -inf }
 0x14f   : > { %1009 = vmax.xlane.f32.xlu1 %v1008_v48  ;;  %v4006_v56 = vpop.f32.mrf.mxu0 }
 0x150   : > { %4866 = vst [vmem:[#allocation12_spill] sm:$0xff] %v4006_v56  ;;  %v1011_v0 = vsel %vm836_vm1, %v4006_v56, -inf }
 0x151   : > { %1012 = vmax.xlane.f32.xlu0 %v1011_v0  ;;  %v4010_v52 = vpop.f32.mrf.mxu0 }
 0x152   : > { %4867 = vst [vmem:[#allocation13_spill] sm:$0xff] %v4010_v52  ;;  %v1020_v48 = vsel %vm836_vm1, %v4010_v52, -inf }
 0x153   : > { %1015 = vmax.xlane.f32.xlu1 %v1014_v16  ;;  %v4014_v24 = vpop.f32.mrf.mxu0 }
 0x154   : > { %4868 = vst [vmem:[#allocation14_spill] sm:$0xff] %v4014_v24  ;;  %v1017_v32 = vsel %vm836_vm1, %v4014_v24, -inf }
 0x155   : > { %1018 = vmax.xlane.f32.xlu0 %v1017_v32  ;;  %v4018_v7 = vpop.f32.mrf.mxu0 }
 0x156   : > { %4869 = vst [vmem:[#allocation15_spill] sm:$0xff] %v4018_v7  ;;  %v1026_v16 = vsel %vm836_vm1, %v4018_v7, -inf }
 0x157   : > { %1021 = vmax.xlane.f32.xlu1 %v1020_v48  ;;  %v4022_v56 = vpop.f32.mrf.mxu0 }
 0x158   : > { %4870 = vst [vmem:[#allocation16_spill] sm:$0xff] %v4022_v56  ;;  %v1023_v0 = vsel %vm836_vm1, %v4022_v56, -inf }
 0x159   : > { %1024 = vmax.xlane.f32.xlu0 %v1023_v0 }
 0x15b   : > { %1027 = vmax.xlane.f32.xlu1 %v1026_v16 }
 0x164   : > { %v842_v40 = vpop.xlane.xlu0 %841 }
 0x165   : > { %v1030_v24 = vsub.f32 %v3772_v2, %v842_v40 }
 0x167   : > { %v1095_v32 = vmul.f32 1.442695, %v1030_v24 }
 0x168   : > { %v839_v60 = vpop.xlane.xlu0 %838  ;;  %v848_v36 = vpop.xlane.xlu1 %847 }
 0x169   : > { %3235 = vpow2.f32 %v1095_v32  ;;  %v1029_v52 = vsub.f32 %v3776_v4, %v839_v60  ;;  %v1032_v48 = vsub.f32 %v3778_v5, %v848_v36 }
 0x16b   : > { %v1093_v44 = vmul.f32 1.442695, %v1029_v52  ;;  %v1099_v20 = vmul.f32 1.442695, %v1032_v48 }
 0x16c   : > { %v845_v28 = vpop.xlane.xlu1 %844 }
 0x16d   : > { %3237 = vpow2.f32 %v1093_v44  ;;  %v1031_v0 = vsub.f32 %v3784_v8, %v845_v28 }
 0x16e   : > { %3239 = vpow2.f32 %v1099_v20  ;;  %v851_v7 = vpop.xlane.xlu0 %850 }
 0x16f   : > { %v1097_v16 = vmul.f32 1.442695, %v1031_v0  ;;  %v1033_v56 = vsub.f32 %v3790_v11, %v851_v7 }
 0x170   : > { %v854_v2 = vpop.xlane.xlu1 %853 }
 0x171   : > { %3241 = vpow2.f32 %v1097_v16  ;;  %v1101_v24 = vmul.f32 1.442695, %v1033_v56  ;;  %v1034_v40 = vsub.f32 %v3786_v9, %v854_v2 }
 0x172   : > { %v857_v32 = vpop.xlane.xlu0 %856 }
 0x173   : > { %3243 = vpow2.f32 %v1101_v24  ;;  %v1103_v4 = vmul.f32 1.442695, %v1034_v40  ;;  %v1035_v5 = vsub.f32 %v3798_v15, %v857_v32 }
 0x174   : > { %v860_v36 = vpop.xlane.xlu1 %859 }
 0x175   : > { %3245 = vpow2.f32 %v1103_v4  ;;  %v1105_v44 = vmul.f32 1.442695, %v1035_v5  ;;  %v1036_v8 = vsub.f32 %v3794_v13, %v860_v36 }
 0x176   : > { %v4036_v20 = vpop.eup %3235  ;;  %v863_v28 = vpop.xlane.xlu0 %862 }
 0x177   : > { %3247 = vpow2.f32 %v1105_v44  ;;  %v1107_v11 = vmul.f32 1.442695, %v1036_v8  ;;  %v1037_v52 = vsub.f32 %v3806_v19, %v863_v28  ;;  %v1224_v9 = vsel %vm836_vm1, %v4036_v20, 0.0 }
 0x178   : > { %v866_v60 = vpop.xlane.xlu1 %865  ;;  %1225 = vadd.xlane.f32.xlu1 %v1224_v9 }
 0x179   : > { %3249 = vpow2.f32 %v1107_v11  ;;  %v1109_v7 = vmul.f32 1.442695, %v1037_v52  ;;  %v1038_v15 = vsub.f32 %v3802_v17, %v866_v60 }
 0x17a   : > { %v4042_v56 = vpop.eup %3237  ;;  %v869_v48 = vpop.xlane.xlu0 %868 }
 0x17b   : > { %v4044_v13 = vpop.eup %3239  ;;  %3251 = vpow2.f32 %v1109_v7  ;;  %v1111_v0 = vmul.f32 1.442695, %v1038_v15  ;;  %v1039_v16 = vsub.f32 %v3814_v23, %v869_v48  ;;  %v1221_v19 = vsel %vm836_vm1, %v4042_v56, 0.0 }
 0x17c   : > { %v872_v2 = vpop.xlane.xlu1 %871  ;;  %v1230_v24 = vsel %vm836_vm1, %v4044_v13, 0.0  ;;  %1222 = vadd.xlane.f32.xlu0 %v1221_v19 }
 0x17d   : > { %3253 = vpow2.f32 %v1111_v0  ;;  %v1113_v40 = vmul.f32 1.442695, %v1039_v16  ;;  %v1040_v17 = vsub.f32 %v3810_v21, %v872_v2  ;;  %1231 = vadd.xlane.f32.xlu1 %v1230_v24 }
 0x17e   : > { %v4052_v32 = vpop.eup %3241  ;;  %v875_v4 = vpop.xlane.xlu0 %874 }
 0x17f   : > { %3255 = vpow2.f32 %v1113_v40  ;;  %v1115_v5 = vmul.f32 1.442695, %v1040_v17  ;;  %v1041_v23 = vsub.f32 %v3822_v27, %v875_v4  ;;  %v1227_v36 = vsel %vm836_vm1, %v4052_v32, 0.0 }
 0x180   : > { %v4057_v44 = vpop.eup %3243  ;;  %v878_v8 = vpop.xlane.xlu1 %877  ;;  %1228 = vadd.xlane.f32.xlu0 %v1227_v36 }
 0x181   : > { %3257 = vpow2.f32 %v1115_v5  ;;  %v1117_v28 = vmul.f32 1.442695, %v1041_v23  ;;  %v1042_v11 = vsub.f32 %v3818_v25, %v878_v8  ;;  %v1233_v9 = vsel %vm836_vm1, %v4057_v44, 0.0 }
 0x182   : > { %v4060_v21 = vpop.eup %3245  ;;  %v881_v52 = vpop.xlane.xlu0 %880 }
 0x183   : > { %3259 = vpow2.f32 %v1117_v28  ;;  %v1119_v60 = vmul.f32 1.442695, %v1042_v11  ;;  %v1043_v27 = vsub.f32 %v3830_v31, %v881_v52  ;;  %v1236_v7 = vsel %vm836_vm1, %v4060_v21, 0.0 }
 0x184   : > { %v4067_v15 = vpop.eup %3247  ;;  %v884_v48 = vpop.xlane.xlu1 %883  ;;  %1237 = vadd.xlane.f32.xlu1 %v1236_v7  ;;  %1234 = vadd.xlane.f32.xlu0 %v1233_v9 }
 0x185   : > { %3261 = vpow2.f32 %v1119_v60  ;;  %v1121_v25 = vmul.f32 1.442695, %v1043_v27  ;;  %v1044_v0 = vsub.f32 %v3826_v29, %v884_v48  ;;  %v1239_v2 = vsel %vm836_vm1, %v4067_v15, 0.0 }
 0x186   : > { %v4070_v16 = vpop.eup %3249  ;;  %v887_v19 = vpop.xlane.xlu0 %886 }
 0x187   : > { %3263 = vpow2.f32 %v1121_v25  ;;  %v1123_v31 = vmul.f32 1.442695, %v1044_v0  ;;  %v1045_v24 = vsub.f32 %v3838_v35, %v887_v19  ;;  %v1242_v40 = vsel %vm836_vm1, %v4070_v16, 0.0  ;;  %v1544_v19 = vld [vmem:[%s4827_s2 + $0x18] sm:$0xff] }
 0x188   : > { %v4077_v17 = vpop.eup %3251  ;;  %v890_v4 = vpop.xlane.xlu1 %889  ;;  %1243 = vadd.xlane.f32.xlu1 %v1242_v40  ;;  %1240 = vadd.xlane.f32.xlu0 %v1239_v2 }
 0x189   : > { %3265 = vpow2.f32 %v1123_v31  ;;  %v1125_v29 = vmul.f32 1.442695, %v1045_v24  ;;  %v1046_v5 = vsub.f32 %v3834_v33, %v890_v4  ;;  %v1245_v8 = vsel %vm836_vm1, %v4077_v17, 0.0  ;;  %v1543_v31 = vld [vmem:[%s4827_s2 + $0x10] sm:$0xff]  ;;  %3043 = vmatprep.subr.mxu1 %v1544_v19 }
 0x18a   : > { %v4080_v23 = vpop.eup %3253  ;;  %v893_v36 = vpop.xlane.xlu0 %892  ;;  %3044 = vmatpush3.msra.mxu1 %v1544_v19 }
 0x18b   : > { %3267 = vpow2.f32 %v1125_v29  ;;  %v1127_v35 = vmul.f32 1.442695, %v1046_v5  ;;  %v1047_v28 = vsub.f32 %v3846_v39, %v893_v36  ;;  %v1248_v11 = vsel %vm836_vm1, %v4080_v23, 0.0  ;;  %3045 = vmatprep.subr.mxu1 %v1543_v31 }
 0x18c   : > { %v4087_v52 = vpop.eup %3255  ;;  %v896_v9 = vpop.xlane.xlu1 %895  ;;  %1249 = vadd.xlane.f32.xlu1 %v1248_v11  ;;  %1246 = vadd.xlane.f32.xlu0 %v1245_v8 }
 0x18d   : > { %3269 = vpow2.f32 %v1127_v35  ;;  %v1129_v33 = vmul.f32 1.442695, %v1047_v28  ;;  %v1048_v60 = vsub.f32 %v3842_v37, %v896_v9  ;;  %v1251_v48 = vsel %vm836_vm1, %v4087_v52, 0.0  ;;  %3046 = vmatpush3.msra.mxu1 %v1543_v31 }
 0x18e   : > { %v4090_v27 = vpop.eup %3257  ;;  %v899_v7 = vpop.xlane.xlu0 %898 }
 0x18f   : > { %3271 = vpow2.f32 %v1129_v33  ;;  %v1131_v39 = vmul.f32 1.442695, %v1048_v60  ;;  %v1049_v25 = vsub.f32 %v3854_v43, %v899_v7  ;;  %v1254_v0 = vsel %vm836_vm1, %v4090_v27, 0.0  ;;  %v1541_v7 = vld [vmem:[%s4827_s2] sm:$0xff] }
 0x190   : > { %v4100_v2 = vpop.eup %3259  ;;  %v902_v37 = vpop.xlane.xlu1 %901  ;;  %1255 = vadd.xlane.f32.xlu1 %v1254_v0  ;;  %1252 = vadd.xlane.f32.xlu0 %v1251_v48 }
 0x191   : > { %3273 = vpow2.f32 %v1131_v39  ;;  %v1133_v24 = vmul.f32 1.442695, %v1049_v25  ;;  %v1050_v43 = vsub.f32 %v3850_v41, %v902_v37  ;;  %v1257_v29 = vsel %vm836_vm1, %v4100_v2, 0.0  ;;  %v1542_v41 = vld [vmem:[%s4827_s2 + $0x8] sm:$0xff] }
 0x192   : > { %v4106_v40 = vpop.eup %3261  ;;  %v905_v4 = vpop.xlane.xlu0 %904  ;;  %3047 = vmatprep.subr.mxu1 %v1542_v41 }
 0x193   : > { %3275 = vpow2.f32 %v1133_v24  ;;  %v1135_v5 = vmul.f32 1.442695, %v1050_v43  ;;  %v1051_v36 = vsub.f32 %v3862_v47, %v905_v4  ;;  %v1260_v8 = vsel %vm836_vm1, %v4106_v40, 0.0  ;;  %3048 = vmatpush3.msra.mxu1 %v1542_v41 }
 0x194   : > { %v4116_v35 = vpop.eup %3263  ;;  %v908_v28 = vpop.xlane.xlu1 %907  ;;  %1261 = vadd.xlane.f32.xlu1 %v1260_v8  ;;  %1258 = vadd.xlane.f32.xlu0 %v1257_v29 }
 0x195   : > { %3277 = vpow2.f32 %v1135_v5  ;;  %v1137_v11 = vmul.f32 1.442695, %v1051_v36  ;;  %v1052_v9 = vsub.f32 %v3858_v45, %v908_v28  ;;  %v1263_v60 = vsel %vm836_vm1, %v4116_v35, 0.0  ;;  %3049 = vmatprep.subr.mxu1 %v1541_v7 }
 0x196   : > { %v4119_v33 = vpop.eup %3265  ;;  %v911_v47 = vpop.xlane.xlu0 %910  ;;  %3050 = vmatpush3.msra.mxu1 %v1541_v7 }
 0x197   : > { %3279 = vpow2.f32 %v1137_v11  ;;  %v1139_v48 = vmul.f32 1.442695, %v1052_v9  ;;  %v1053_v39 = vsub.f32 %v3870_v51, %v911_v47  ;;  %v1266_v25 = vsel %vm836_vm1, %v4119_v33, 0.0 }
 0x198   : > { %v4129_v45 = vpop.eup %3267  ;;  %v914_v0 = vpop.xlane.xlu1 %913  ;;  %1267 = vadd.xlane.f32.xlu1 %v1266_v25  ;;  %1264 = vadd.xlane.f32.xlu0 %v1263_v60 }
 0x199   : > { %3281 = vpow2.f32 %v1139_v48  ;;  %v1141_v19 = vmul.f32 1.442695, %v1053_v39  ;;  %v1054_v37 = vsub.f32 %v3866_v49, %v914_v0  ;;  %v1269_v51 = vsel %vm836_vm1, %v4129_v45, 0.0 }
 0x19a   : > { %v4132_v31 = vpop.eup %3269  ;;  %v917_v24 = vpop.xlane.xlu0 %916 }
 0x19b   : > { %3283 = vpow2.f32 %v1141_v19  ;;  %v1143_v43 = vmul.f32 1.442695, %v1054_v37  ;;  %v1055_v4 = vsub.f32 %v3878_v55, %v917_v24  ;;  %v1272_v29 = vsel %vm836_vm1, %v4132_v31, 0.0 }
 0x19c   : > { %v4139_v5 = vpop.eup %3271  ;;  %v920_v36 = vpop.xlane.xlu1 %919  ;;  %1273 = vadd.xlane.f32.xlu1 %v1272_v29  ;;  %1270 = vadd.xlane.f32.xlu0 %v1269_v51 }
 0x19d   : > { %3285 = vpow2.f32 %v1143_v43  ;;  %v1145_v49 = vmul.f32 1.442695, %v1055_v4  ;;  %v1056_v8 = vsub.f32 %v3874_v53, %v920_v36  ;;  %v1275_v11 = vsel %vm836_vm1, %v4139_v5, 0.0 }
 0x19e   : > { %v4142_v41 = vpop.eup %3273  ;;  %v923_v28 = vpop.xlane.xlu0 %922 }
 0x19f   : > { %3287 = vpow2.f32 %v1145_v49  ;;  %v1147_v55 = vmul.f32 1.442695, %v1056_v8  ;;  %v1057_v9 = vsub.f32 %v3886_v59, %v923_v28  ;;  %v1278_v47 = vsel %vm836_vm1, %v4142_v41, 0.0 }
 0x1a0   : > { %v4149_v60 = vpop.eup %3275  ;;  %v926_v7 = vpop.xlane.xlu1 %925  ;;  %1279 = vadd.xlane.f32.xlu1 %v1278_v47  ;;  %1276 = vadd.xlane.f32.xlu0 %v1275_v11 }
 0x1a1   : > { %3289 = vpow2.f32 %v1147_v55  ;;  %v1149_v53 = vmul.f32 1.442695, %v1057_v9  ;;  %v1058_v48 = vsub.f32 %v3882_v57, %v926_v7  ;;  %v1281_v0 = vsel %vm836_vm1, %v4149_v60, 0.0 }
 0x1a2   : > { %v4152_v39 = vpop.eup %3277  ;;  %v929_v25 = vpop.xlane.xlu0 %928 }
 0x1a3   : > { %3291 = vpow2.f32 %v1149_v53  ;;  %v1151_v59 = vmul.f32 1.442695, %v1058_v48  ;;  %v1059_v19 = vsub.f32 %v3894_v63, %v929_v25  ;;  %v1284_v37 = vsel %vm836_vm1, %v4152_v39, 0.0 }
 0x1a4   : > { %v4159_v24 = vpop.eup %3279  ;;  %v932_v51 = vpop.xlane.xlu1 %931  ;;  %1285 = vadd.xlane.f32.xlu1 %v1284_v37  ;;  %1282 = vadd.xlane.f32.xlu0 %v1281_v0 }
 0x1a5   : > { %3293 = vpow2.f32 %v1151_v59  ;;  %v1153_v57 = vmul.f32 1.442695, %v1059_v19  ;;  %v1060_v43 = vsub.f32 %v3890_v61, %v932_v51  ;;  %v1287_v36 = vsel %vm836_vm1, %v4159_v24, 0.0 }
 0x1a6   : > { %v4162_v4 = vpop.eup %3281  ;;  %v935_v29 = vpop.xlane.xlu0 %934 }
 0x1a7   : > { %3295 = vpow2.f32 %v1153_v57  ;;  %v1155_v63 = vmul.f32 1.442695, %v1060_v43  ;;  %v1061_v49 = vsub.f32 %v3902_v6, %v935_v29  ;;  %v1290_v8 = vsel %vm836_vm1, %v4162_v4, 0.0 }
 0x1a8   : > { %v4169_v28 = vpop.eup %3283  ;;  %v938_v11 = vpop.xlane.xlu1 %937  ;;  %1291 = vadd.xlane.f32.xlu1 %v1290_v8  ;;  %1288 = vadd.xlane.f32.xlu0 %v1287_v36 }
 0x1a9   : > { %3297 = vpow2.f32 %v1155_v63  ;;  %v1157_v61 = vmul.f32 1.442695, %v1061_v49  ;;  %v1062_v55 = vsub.f32 %v3898_v1, %v938_v11  ;;  %v1293_v7 = vsel %vm836_vm1, %v4169_v28, 0.0 }
 0x1aa   : > { %v4172_v9 = vpop.eup %3285  ;;  %v941_v47 = vpop.xlane.xlu0 %940 }
 0x1ab   : > { %3299 = vpow2.f32 %v1157_v61  ;;  %v1159_v6 = vmul.f32 1.442695, %v1062_v55  ;;  %v1063_v53 = vsub.f32 %v3910_v14, %v941_v47  ;;  %v1296_v48 = vsel %vm836_vm1, %v4172_v9, 0.0 }
 0x1ac   : > { %v4179_v25 = vpop.eup %3287  ;;  %v944_v0 = vpop.xlane.xlu1 %943  ;;  %1297 = vadd.xlane.f32.xlu1 %v1296_v48  ;;  %1294 = vadd.xlane.f32.xlu0 %v1293_v7 }
 0x1ad   : > { %3301 = vpow2.f32 %v1159_v6  ;;  %v1161_v1 = vmul.f32 1.442695, %v1063_v53  ;;  %v1064_v59 = vsub.f32 %v3906_v10, %v944_v0  ;;  %v1299_v51 = vsel %vm836_vm1, %v4179_v25, 0.0 }
 0x1ae   : > { %v4182_v19 = vpop.eup %3289  ;;  %v947_v37 = vpop.xlane.xlu0 %946 }
 0x1af   : > { %3303 = vpow2.f32 %v1161_v1  ;;  %v1163_v14 = vmul.f32 1.442695, %v1064_v59  ;;  %v1065_v57 = vsub.f32 %v3918_v22, %v947_v37  ;;  %v1302_v43 = vsel %vm836_vm1, %v4182_v19, 0.0 }
 0x1b0   : > { %v4189_v29 = vpop.eup %3291  ;;  %v950_v36 = vpop.xlane.xlu1 %949  ;;  %1303 = vadd.xlane.f32.xlu1 %v1302_v43  ;;  %1300 = vadd.xlane.f32.xlu0 %v1299_v51 }
 0x1b1   : > { %3305 = vpow2.f32 %v1163_v14  ;;  %v1165_v10 = vmul.f32 1.442695, %v1065_v57  ;;  %v1066_v63 = vsub.f32 %v3914_v18, %v950_v36  ;;  %v1305_v11 = vsel %vm836_vm1, %v4189_v29, 0.0 }
 0x1b2   : > { %v4192_v49 = vpop.eup %3293  ;;  %v953_v8 = vpop.xlane.xlu0 %952 }
 0x1b3   : > { %3307 = vpow2.f32 %v1165_v10  ;;  %v1167_v22 = vmul.f32 1.442695, %v1066_v63  ;;  %v1067_v61 = vsub.f32 %v3926_v30, %v953_v8  ;;  %v1308_v55 = vsel %vm836_vm1, %v4192_v49, 0.0 }
 0x1b4   : > { %v4199_v47 = vpop.eup %3295  ;;  %v956_v7 = vpop.xlane.xlu1 %955  ;;  %1309 = vadd.xlane.f32.xlu1 %v1308_v55  ;;  %1306 = vadd.xlane.f32.xlu0 %v1305_v11 }
 0x1b5   : > { %3309 = vpow2.f32 %v1167_v22  ;;  %v1169_v18 = vmul.f32 1.442695, %v1067_v61  ;;  %v1068_v6 = vsub.f32 %v3922_v26, %v956_v7  ;;  %v1311_v0 = vsel %vm836_vm1, %v4199_v47, 0.0 }
 0x1b6   : > { %v4202_v53 = vpop.eup %3297  ;;  %v959_v48 = vpop.xlane.xlu0 %958 }
 0x1b7   : > { %3311 = vpow2.f32 %v1169_v18  ;;  %v1171_v30 = vmul.f32 1.442695, %v1068_v6  ;;  %v1069_v1 = vsub.f32 %v3934_v38, %v959_v48  ;;  %v1314_v59 = vsel %vm836_vm1, %v4202_v53, 0.0 }
 0x1b8   : > { %v4209_v37 = vpop.eup %3299  ;;  %v962_v51 = vpop.xlane.xlu1 %961  ;;  %1315 = vadd.xlane.f32.xlu1 %v1314_v59  ;;  %1312 = vadd.xlane.f32.xlu0 %v1311_v0 }
 0x1b9   : > { %3313 = vpow2.f32 %v1171_v30  ;;  %v1173_v26 = vmul.f32 1.442695, %v1069_v1  ;;  %v1070_v14 = vsub.f32 %v3930_v34, %v962_v51  ;;  %v1317_v36 = vsel %vm836_vm1, %v4209_v37, 0.0 }
 0x1ba   : > { %v4212_v57 = vpop.eup %3301  ;;  %v965_v43 = vpop.xlane.xlu0 %964 }
 0x1bb   : > { %3315 = vpow2.f32 %v1173_v26  ;;  %v1175_v38 = vmul.f32 1.442695, %v1070_v14  ;;  %v1071_v10 = vsub.f32 %v3942_v46, %v965_v43  ;;  %v1320_v63 = vsel %vm836_vm1, %v4212_v57, 0.0 }
 0x1bc   : > { %v4219_v8 = vpop.eup %3303  ;;  %v968_v11 = vpop.xlane.xlu1 %967  ;;  %1321 = vadd.xlane.f32.xlu1 %v1320_v63  ;;  %1318 = vadd.xlane.f32.xlu0 %v1317_v36 }
 0x1bd   : > { %3317 = vpow2.f32 %v1175_v38  ;;  %v1177_v34 = vmul.f32 1.442695, %v1071_v10  ;;  %v1072_v22 = vsub.f32 %v3938_v42, %v968_v11  ;;  %v1323_v7 = vsel %vm836_vm1, %v4219_v8, 0.0 }
 0x1be   : > { %v4222_v61 = vpop.eup %3305  ;;  %v971_v55 = vpop.xlane.xlu0 %970 }
 0x1bf   : > { %3319 = vpow2.f32 %v1177_v34  ;;  %v1179_v46 = vmul.f32 1.442695, %v1072_v22  ;;  %v1073_v18 = vsub.f32 %v3950_v54, %v971_v55  ;;  %v1326_v6 = vsel %vm836_vm1, %v4222_v61, 0.0 }
 0x1c0   : > { %v4229_v48 = vpop.eup %3307  ;;  %v974_v0 = vpop.xlane.xlu1 %973  ;;  %1327 = vadd.xlane.f32.xlu1 %v1326_v6  ;;  %1324 = vadd.xlane.f32.xlu0 %v1323_v7 }
 0x1c1   : > { %3321 = vpow2.f32 %v1179_v46  ;;  %v1181_v42 = vmul.f32 1.442695, %v1073_v18  ;;  %v1074_v30 = vsub.f32 %v3946_v50, %v974_v0  ;;  %v1329_v51 = vsel %vm836_vm1, %v4229_v48, 0.0 }
 0x1c2   : > { %v4232_v1 = vpop.eup %3309  ;;  %v977_v59 = vpop.xlane.xlu0 %976 }
 0x1c3   : > { %3323 = vpow2.f32 %v1181_v42  ;;  %v1183_v54 = vmul.f32 1.442695, %v1074_v30  ;;  %v1075_v26 = vsub.f32 %v3958_v62, %v977_v59  ;;  %v1332_v14 = vsel %vm836_vm1, %v4232_v1, 0.0  ;;  %v4871_v42 = vld [vmem:[#allocation4_spill] sm:$0xff] }
 0x1c4   : > { %v4239_v43 = vpop.eup %3311  ;;  %v980_v36 = vpop.xlane.xlu1 %979  ;;  %1333 = vadd.xlane.f32.xlu1 %v1332_v14  ;;  %1330 = vadd.xlane.f32.xlu0 %v1329_v51 }
 0x1c5   : > { %3325 = vpow2.f32 %v1183_v54  ;;  %v1185_v50 = vmul.f32 1.442695, %v1075_v26  ;;  %v1076_v38 = vsub.f32 %v3954_v58, %v980_v36  ;;  %v1335_v11 = vsel %vm836_vm1, %v4239_v43, 0.0  ;;  %v4872_v26 = vld [vmem:[#allocation3_spill] sm:$0xff] }
 0x1c6   : > { %v4242_v10 = vpop.eup %3313  ;;  %v983_v63 = vpop.xlane.xlu0 %982 }
 0x1c7   : > { %3327 = vpow2.f32 %v1185_v50  ;;  %v1187_v62 = vmul.f32 1.442695, %v1076_v38  ;;  %v1077_v34 = vsub.f32 %v3966_v12, %v983_v63  ;;  %v1338_v22 = vsel %vm836_vm1, %v4242_v10, 0.0 }
 0x1c8   : > { %v4249_v55 = vpop.eup %3315  ;;  %v986_v7 = vpop.xlane.xlu1 %985  ;;  %1339 = vadd.xlane.f32.xlu1 %v1338_v22  ;;  %1336 = vadd.xlane.f32.xlu0 %v1335_v11  ;;  %v4873_v11 = vld [vmem:[#allocation6_spill] sm:$0xff] }
 0x1c9   : > { %3329 = vpow2.f32 %v1187_v62  ;;  %v1189_v58 = vmul.f32 1.442695, %v1077_v34  ;;  %v1078_v46 = vsub.f32 %v3962_v3, %v986_v7  ;;  %v1341_v0 = vsel %vm836_vm1, %v4249_v55, 0.0 }
 0x1ca   : > { %v4252_v18 = vpop.eup %3317  ;;  %v989_v6 = vpop.xlane.xlu0 %988 }
 0x1cb   : > { %3331 = vpow2.f32 %v1189_v58  ;;  %v1191_v12 = vmul.f32 1.442695, %v1078_v46  ;;  %v1079_v30 = vsub.f32 %v4871_v42, %v989_v6  ;;  %v1344_v59 = vsel %vm836_vm1, %v4252_v18, 0.0  ;;  %v4874_v46 = vld [vmem:[#allocation5_spill] sm:$0xff] }
 0x1cc   : > { %v4259_v51 = vpop.eup %3319  ;;  %v992_v54 = vpop.xlane.xlu1 %991  ;;  %1345 = vadd.xlane.f32.xlu1 %v1344_v59  ;;  %1342 = vadd.xlane.f32.xlu0 %v1341_v0  ;;  %v4875_v59 = vld [vmem:[#allocation8_spill] sm:$0xff] }
 0x1cd   : > { %3333 = vpow2.f32 %v1191_v12  ;;  %v1193_v3 = vmul.f32 1.442695, %v1079_v30  ;;  %v1080_v14 = vsub.f32 %v4872_v26, %v992_v54  ;;  %v1347_v38 = vsel %vm836_vm1, %v4259_v51, 0.0 }
 0x1ce   : > { %v4262_v36 = vpop.eup %3321  ;;  %v995_v50 = vpop.xlane.xlu0 %994 }
 0x1cf   : > { %3335 = vpow2.f32 %v1193_v3  ;;  %v1195_v63 = vmul.f32 1.442695, %v1080_v14  ;;  %v1081_v62 = vsub.f32 %v4873_v11, %v995_v50  ;;  %v1350_v34 = vsel %vm836_vm1, %v4262_v36, 0.0 }
 0x1d0   : > { %v4269_v22 = vpop.eup %3323  ;;  %v998_v7 = vpop.xlane.xlu1 %997  ;;  %1351 = vadd.xlane.f32.xlu1 %v1350_v34  ;;  %1348 = vadd.xlane.f32.xlu0 %v1347_v38  ;;  %v4877_v38 = vld [vmem:[#allocation7_spill] sm:$0xff] }
 0x1d1   : > { %3337 = vpow2.f32 %v1195_v63  ;;  %v1197_v58 = vmul.f32 1.442695, %v1081_v62  ;;  %v1082_v6 = vsub.f32 %v4874_v46, %v998_v7  ;;  %v1353_v42 = vsel %vm836_vm1, %v4269_v22, 0.0 }
 0x1d2   : > { %v4272_v0 = vpop.eup %3325  ;;  %v1001_v12 = vpop.xlane.xlu0 %1000 }
 0x1d3   : > { %3339 = vpow2.f32 %v1197_v58  ;;  %v1199_v30 = vmul.f32 1.442695, %v1082_v6  ;;  %v1083_v54 = vsub.f32 %v4875_v59, %v1001_v12  ;;  %v1356_v3 = vsel %vm836_vm1, %v4272_v0, 0.0  ;;  %v4878_v58 = vld [vmem:[#allocation10_spill] sm:$0xff]  ;;  %v4880_v59 = vld [vmem:[#allocation9_spill] sm:$0xff] }
 0x1d4   : > { %v4279_v26 = vpop.eup %3327  ;;  %v1004_v14 = vpop.xlane.xlu1 %1003  ;;  %1357 = vadd.xlane.f32.xlu1 %v1356_v3  ;;  %1354 = vadd.xlane.f32.xlu0 %v1353_v42 }
 0x1d5   : > { %4876 = vst [vmem:[#allocation4_spill] sm:$0xff] %v4279_v26  ;;  %3341 = vpow2.f32 %v1199_v30  ;;  %v1201_v50 = vmul.f32 1.442695, %v1083_v54  ;;  %v1084_v63 = vsub.f32 %v4877_v38, %v1004_v14  ;;  %v1359_v34 = vsel %vm836_vm1, %v4279_v26, 0.0 }
 0x1d6   : > { %v4282_v11 = vpop.eup %3329  ;;  %v1007_v62 = vpop.xlane.xlu0 %1006 }
 0x1d7   : > { %3343 = vpow2.f32 %v1201_v50  ;;  %v1203_v7 = vmul.f32 1.442695, %v1084_v63  ;;  %v1085_v46 = vsub.f32 %v4878_v58, %v1007_v62  ;;  %v1362_v6 = vsel %vm836_vm1, %v4282_v11, 0.0  ;;  %v4882_v63 = vld [vmem:[#allocation12_spill] sm:$0xff] }
 0x1d8   : > { %v4289_v12 = vpop.eup %3331  ;;  %v1010_v42 = vpop.xlane.xlu1 %1009  ;;  %1363 = vadd.xlane.f32.xlu1 %v1362_v6  ;;  %1360 = vadd.xlane.f32.xlu0 %v1359_v34 }
 0x1d9   : > { %4879 = vst [vmem:[#allocation3_spill] sm:$0xff] %v4289_v12  ;;  %3345 = vpow2.f32 %v1203_v7  ;;  %v1205_v30 = vmul.f32 1.442695, %v1085_v46  ;;  %v1086_v54 = vsub.f32 %v4880_v59, %v1010_v42  ;;  %v1365_v50 = vsel %vm836_vm1, %v4289_v12, 0.0  ;;  %v4884_v46 = vld [vmem:[#allocation11_spill] sm:$0xff] }
 0x1da   : > { %v4292_v3 = vpop.eup %3333  ;;  %v1013_v14 = vpop.xlane.xlu0 %1012 }
 0x1db   : > { %4881 = vst [vmem:[#allocation6_spill] sm:$0xff] %v4292_v3  ;;  %3347 = vpow2.f32 %v1205_v30  ;;  %v1207_v38 = vmul.f32 1.442695, %v1086_v54  ;;  %v1087_v62 = vsub.f32 %v4882_v63, %v1013_v14  ;;  %v1368_v58 = vsel %vm836_vm1, %v4292_v3, 0.0  ;;  %v4886_v14 = vld [vmem:[#allocation14_spill] sm:$0xff] }
 0x1dc   : > { %v4299_v26 = vpop.eup %3335  ;;  %v1016_v34 = vpop.xlane.xlu1 %1015  ;;  %1369 = vadd.xlane.f32.xlu1 %v1368_v58  ;;  %1366 = vadd.xlane.f32.xlu0 %v1365_v50 }
 0x1dd   : > { %4883 = vst [vmem:[#allocation5_spill] sm:$0xff] %v4299_v26  ;;  %3349 = vpow2.f32 %v1207_v38  ;;  %v1209_v7 = vmul.f32 1.442695, %v1087_v62  ;;  %v1088_v6 = vsub.f32 %v4884_v46, %v1016_v34  ;;  %v1371_v30 = vsel %vm836_vm1, %v4299_v26, 0.0  ;;  %v4887_v62 = vld [vmem:[#allocation13_spill] sm:$0xff] }
 0x1de   : > { %v4302_v42 = vpop.eup %3337  ;;  %v1019_v59 = vpop.xlane.xlu0 %1018 }
 0x1df   : > { %4885 = vst [vmem:[#allocation8_spill] sm:$0xff] %v4302_v42  ;;  %3351 = vpow2.f32 %v1209_v7  ;;  %v1211_v54 = vmul.f32 1.442695, %v1088_v6  ;;  %v1089_v63 = vsub.f32 %v4886_v14, %v1019_v59  ;;  %v1374_v12 = vsel %vm836_vm1, %v4302_v42, 0.0  ;;  %v4888_v59 = vld [vmem:[#allocation16_spill] sm:$0xff] }
 0x1e0   : > { %v4309_v3 = vpop.eup %3339  ;;  %v1022_v50 = vpop.xlane.xlu1 %1021  ;;  %1375 = vadd.xlane.f32.xlu1 %v1374_v12  ;;  %1372 = vadd.xlane.f32.xlu0 %v1371_v30 }
 0x1e1   : > { %3353 = vpow2.f32 %v1211_v54  ;;  %v1213_v38 = vmul.f32 1.442695, %v1089_v63  ;;  %v1090_v58 = vsub.f32 %v4887_v62, %v1022_v50  ;;  %v1377_v7 = vsel %vm836_vm1, %v4309_v3, 0.0  ;;  %v4889_v54 = vld [vmem:[#allocation15_spill] sm:$0xff] }
 0x1e2   : > { %v4312_v34 = vpop.eup %3341  ;;  %v1025_v46 = vpop.xlane.xlu0 %1024 }
 0x1e3   : > { %3355 = vpow2.f32 %v1213_v38  ;;  %v1215_v6 = vmul.f32 1.442695, %v1090_v58  ;;  %v1091_v14 = vsub.f32 %v4888_v59, %v1025_v46  ;;  %v1380_v26 = vsel %vm836_vm1, %v4312_v34, 0.0 }
 0x1e4   : > { %v4319_v42 = vpop.eup %3343  ;;  %1381 = vadd.xlane.f32.xlu1 %v1380_v26  ;;  %v1028_v12 = vpop.xlane.xlu1 %1027  ;;  %1378 = vadd.xlane.f32.xlu0 %v1377_v7 }
 0x1e5   : > { %3357 = vpow2.f32 %v1215_v6  ;;  %v1217_v30 = vmul.f32 1.442695, %v1091_v14  ;;  %v1092_v63 = vsub.f32 %v4889_v54, %v1028_v12  ;;  %v1383_v58 = vsel %vm836_vm1, %v4319_v42, 0.0 }
 0x1e6   : > { %v4322_v50 = vpop.eup %3345 }
 0x1e7   : > { %3359 = vpow2.f32 %v1217_v30  ;;  %v1219_v62 = vmul.f32 1.442695, %v1092_v63  ;;  %v1386_v38 = vsel %vm836_vm1, %v4322_v50, 0.0 }
 0x1e8   : > { %v4328_v46 = vpop.eup %3347  ;;  %1387 = vadd.xlane.f32.xlu1 %v1386_v38  ;;  %1384 = vadd.xlane.f32.xlu0 %v1383_v58 }
 0x1e9   : > { %4890 = vst [vmem:[#allocation7_spill] sm:$0xff] %v4328_v46  ;;  %3361 = vpow2.f32 %v1219_v62  ;;  %v1389_v6 = vsel %vm836_vm1, %v4328_v46, 0.0 }
 0x1ea   : > { %v4330_v26 = vpop.eup %3349 }
 0x1eb   : > { %4891 = vst [vmem:[#allocation10_spill] sm:$0xff] %v4330_v26  ;;  %v1392_v7 = vsel %vm836_vm1, %v4330_v26, 0.0 }
 0x1ec   : > { %v4336_v59 = vpop.eup %3351  ;;  %1393 = vadd.xlane.f32.xlu1 %v1392_v7  ;;  %1390 = vadd.xlane.f32.xlu0 %v1389_v6 }
 0x1ed   : > { %4892 = vst [vmem:[#allocation9_spill] sm:$0xff] %v4336_v59  ;;  %v1395_v30 = vsel %vm836_vm1, %v4336_v59, 0.0 }
 0x1ee   : > { %v4338_v14 = vpop.eup %3353 }
 0x1ef   : > { %4893 = vst [vmem:[#allocation12_spill] sm:$0xff] %v4338_v14  ;;  %v1398_v12 = vsel %vm836_vm1, %v4338_v14, 0.0 }
 0x1f0   : > { %v4344_v54 = vpop.eup %3355  ;;  %1399 = vadd.xlane.f32.xlu1 %v1398_v12  ;;  %1396 = vadd.xlane.f32.xlu0 %v1395_v30 }
 0x1f1   : > { %4894 = vst [vmem:[#allocation11_spill] sm:$0xff] %v4344_v54  ;;  %v1401_v38 = vsel %vm836_vm1, %v4344_v54, 0.0 }
 0x1f2   : > { %v4346_v63 = vpop.eup %3357 }
 0x1f3   : > { %4895 = vst [vmem:[#allocation14_spill] sm:$0xff] %v4346_v63  ;;  %v1404_v62 = vsel %vm836_vm1, %v4346_v63, 0.0 }
 0x1f4   : > { %v4352_v58 = vpop.eup %3359  ;;  %1405 = vadd.xlane.f32.xlu1 %v1404_v62  ;;  %1402 = vadd.xlane.f32.xlu0 %v1401_v38 }
 0x1f5   : > { %4896 = vst [vmem:[#allocation13_spill] sm:$0xff] %v4352_v58  ;;  %v1407_v12 = vsel %vm836_vm1, %v4352_v58, 0.0 }
 0x1f6   : > { %v4354_v7 = vpop.eup %3361 }
 0x1f7   : > { %4897 = vst [vmem:[#allocation16_spill] sm:$0xff] %v4354_v7  ;;  %v1410_v6 = vsel %vm836_vm1, %v4354_v7, 0.0 }
 0x1f8   : > { %1411 = vadd.xlane.f32.xlu1 %v1410_v6  ;;  %1408 = vadd.xlane.f32.xlu0 %v1407_v12 }
 0x201   : > { %v1226_v30 = vpop.xlane.xlu1 %1225 }
 0x202   : > { %3363 = vrcp.f32 %v1226_v30 }
 0x205   : > { %v1223_v63 = vpop.xlane.xlu0 %1222 }
 0x206   : > { %v1232_v59 = vpop.xlane.xlu1 %1231  ;;  %3365 = vrcp.f32 %v1223_v63 }
 0x207   : > { %3367 = vrcp.f32 %v1232_v59 }
 0x209   : > { %v1229_v54 = vpop.xlane.xlu0 %1228 }
 0x20a   : > { %3369 = vrcp.f32 %v1229_v54 }
 0x20d   : > { %v1238_v62 = vpop.xlane.xlu1 %1237  ;;  %v1235_v38 = vpop.xlane.xlu0 %1234 }
 0x20e   : > { %3371 = vrcp.f32 %v1238_v62 }
 0x20f   : > { %3373 = vrcp.f32 %v1235_v38  ;;  %v3364_v7 = vpop.eup %3363 }
 0x210   : > { %v1416_v58 = vmul.f32 %v3364_v7, %v4036_v20 }
 0x211   : > { %v1244_v14 = vpop.xlane.xlu1 %1243  ;;  %v1241_v46 = vpop.xlane.xlu0 %1240 }
 0x212   : > { %3375 = vrcp.f32 %v1244_v14 }
 0x213   : > { %v3366_v26 = vpop.eup %3365  ;;  %3377 = vrcp.f32 %v1241_v46 }
 0x214   : > { %v1414_v6 = vmul.f32 %v3366_v26, %v4042_v56  ;;  %v3368_v63 = vpop.eup %3367 }
 0x215   : > { %v1250_v12 = vpop.xlane.xlu1 %1249  ;;  %v1247_v30 = vpop.xlane.xlu0 %1246  ;;  %v1420_v46 = vmul.f32 %v3368_v63, %v4044_v13 }
 0x216   : > { %3379 = vrcp.f32 %v1250_v12  ;;  %3051 = vmatprep.mubr.msk.f32.mxu1 %vm836_vm1, %v1414_v6 }
 0x217   : > { %v3370_v59 = vpop.eup %3369  ;;  %3381 = vrcp.f32 %v1247_v30  ;;  %3052 = vmatmul.mubr.msk.f32.vlgmr.msra.gmra.mxu1 %vm836_vm1, %v1416_v58 }
 0x218   : > { %v1418_v54 = vmul.f32 %v3370_v59, %v4052_v32 }
 0x219   : > { %v1256_v62 = vpop.xlane.xlu1 %1255  ;;  %v1253_v14 = vpop.xlane.xlu0 %1252 }
 0x21a   : > { %3383 = vrcp.f32 %v1256_v62  ;;  %3054 = vmatprep.mubr.msk.f32.mxu1 %vm836_vm1, %v1418_v54 }
 0x21b   : > { %v3372_v56 = vpop.eup %3371  ;;  %3385 = vrcp.f32 %v1253_v14  ;;  %3055 = vmatmul.mubr.msk.f32.gmra.mxu1 %vm836_vm1, %v1420_v46 }
 0x21c   : > { %v3374_v20 = vpop.eup %3373  ;;  %v1424_v26 = vmul.f32 %v3372_v56, %v4060_v21 }
 0x21d   : > { %v1262_v7 = vpop.xlane.xlu1 %1261  ;;  %v1259_v38 = vpop.xlane.xlu0 %1258  ;;  %v1422_v58 = vmul.f32 %v3374_v20, %v4057_v44 }
 0x21e   : > { %3387 = vrcp.f32 %v1262_v7 }
 0x21f   : > { %v3376_v32 = vpop.eup %3375  ;;  %3389 = vrcp.f32 %v1259_v38  ;;  %3057 = vmatprep.mubr.msk.f32.mxu1 %vm836_vm1, %v1422_v58 }
 0x220   : > { %v3378_v13 = vpop.eup %3377  ;;  %3058 = vmatmul.mubr.msk.f32.gmra.mxu1 %vm836_vm1, %v1424_v26  ;;  %v1428_v6 = vmul.f32 %v3376_v32, %v4070_v16 }
 0x221   : > { %v1268_v12 = vpop.xlane.xlu1 %1267  ;;  %v1265_v30 = vpop.xlane.xlu0 %1264  ;;  %v1426_v63 = vmul.f32 %v3378_v13, %v4067_v15 }
 0x222   : > { %3391 = vrcp.f32 %v1268_v12 }
 0x223   : > { %v3380_v21 = vpop.eup %3379  ;;  %3393 = vrcp.f32 %v1265_v30  ;;  %3060 = vmatprep.mubr.msk.f32.mxu1 %vm836_vm1, %v1426_v63 }
 0x224   : > { %v3382_v44 = vpop.eup %3381  ;;  %3061 = vmatmul.mubr.msk.f32.gmra.mxu1 %vm836_vm1, %v1428_v6  ;;  %v1432_v59 = vmul.f32 %v3380_v21, %v4080_v23 }
 0x225   : > { %v1274_v54 = vpop.xlane.xlu1 %1273  ;;  %v1271_v62 = vpop.xlane.xlu0 %1270  ;;  %v1430_v14 = vmul.f32 %v3382_v44, %v4077_v17 }
 0x226   : > { %3395 = vrcp.f32 %v1274_v54 }
 0x227   : > { %v3384_v16 = vpop.eup %3383  ;;  %3397 = vrcp.f32 %v1271_v62  ;;  %3063 = vmatprep.mubr.msk.f32.mxu1 %vm836_vm1, %v1430_v14 }
 0x228   : > { %v3386_v15 = vpop.eup %3385  ;;  %3064 = vmatmul.mubr.msk.f32.gmra.mxu1 %vm836_vm1, %v1432_v59  ;;  %v1436_v46 = vmul.f32 %v3384_v16, %v4090_v27 }
 0x229   : > { %v1280_v56 = vpop.xlane.xlu1 %1279  ;;  %v1277_v20 = vpop.xlane.xlu0 %1276  ;;  %v1434_v26 = vmul.f32 %v3386_v15, %v4087_v52 }
 0x22a   : > { %3399 = vrcp.f32 %v1280_v56 }
 0x22b   : > { %v3388_v23 = vpop.eup %3387  ;;  %3401 = vrcp.f32 %v1277_v20  ;;  %3066 = vmatprep.mubr.msk.f32.mxu1 %vm836_vm1, %v1434_v26 }
 0x22c   : > { %v3390_v17 = vpop.eup %3389  ;;  %3067 = vmatmul.mubr.msk.f32.gmra.mxu1 %vm836_vm1, %v1436_v46  ;;  %v1440_v7 = vmul.f32 %v3388_v23, %v4106_v40 }
 0x22d   : > { %v1286_v38 = vpop.xlane.xlu1 %1285  ;;  %v1283_v58 = vpop.xlane.xlu0 %1282  ;;  %v1438_v32 = vmul.f32 %v3390_v17, %v4100_v2 }
 0x22e   : > { %3403 = vrcp.f32 %v1286_v38 }
 0x22f   : > { %v3392_v27 = vpop.eup %3391  ;;  %3405 = vrcp.f32 %v1283_v58  ;;  %3069 = vmatprep.mubr.msk.f32.mxu1 %vm836_vm1, %v1438_v32 }
 0x230   : > { %v3394_v52 = vpop.eup %3393  ;;  %3070 = vmatmul.mubr.msk.f32.gmra.mxu1 %vm836_vm1, %v1440_v7  ;;  %v1444_v13 = vmul.f32 %v3392_v27, %v4119_v33 }
 0x231   : > { %v1292_v6 = vpop.xlane.xlu1 %1291  ;;  %v1289_v12 = vpop.xlane.xlu0 %1288  ;;  %v1442_v30 = vmul.f32 %v3394_v52, %v4116_v35 }
 0x232   : > { %3407 = vrcp.f32 %v1292_v6 }
 0x233   : > { %v3396_v40 = vpop.eup %3395  ;;  %3409 = vrcp.f32 %v1289_v12  ;;  %3072 = vmatprep.mubr.msk.f32.mxu1 %vm836_vm1, %v1442_v30 }
 0x234   : > { %v3398_v2 = vpop.eup %3397  ;;  %3073 = vmatmul.mubr.msk.f32.gmra.mxu1 %vm836_vm1, %v1444_v13  ;;  %v1448_v63 = vmul.f32 %v3396_v40, %v4132_v31 }
 0x235   : > { %v1298_v21 = vpop.xlane.xlu1 %1297  ;;  %v1295_v44 = vpop.xlane.xlu0 %1294  ;;  %v1446_v59 = vmul.f32 %v3398_v2, %v4129_v45 }
 0x236   : > { %3411 = vrcp.f32 %v1298_v21 }
 0x237   : > { %v3400_v33 = vpop.eup %3399  ;;  %3413 = vrcp.f32 %v1295_v44  ;;  %3075 = vmatprep.mubr.msk.f32.mxu1 %vm836_vm1, %v1446_v59 }
 0x238   : > { %v3402_v35 = vpop.eup %3401  ;;  %3076 = vmatmul.mubr.msk.f32.gmra.mxu1 %vm836_vm1, %v1448_v63  ;;  %v1452_v54 = vmul.f32 %v3400_v33, %v4142_v41 }
 0x239   : > { %v1304_v62 = vpop.xlane.xlu1 %1303  ;;  %v1301_v14 = vpop.xlane.xlu0 %1300  ;;  %v1450_v16 = vmul.f32 %v3402_v35, %v4139_v5 }
 0x23a   : > { %3415 = vrcp.f32 %v1304_v62 }
 0x23b   : > { %v3404_v31 = vpop.eup %3403  ;;  %3417 = vrcp.f32 %v1301_v14  ;;  %3078 = vmatprep.mubr.msk.f32.mxu1 %vm836_vm1, %v1450_v16 }
 0x23c   : > { %v3406_v45 = vpop.eup %3405  ;;  %3079 = vmatmul.mubr.msk.f32.gmra.mxu1 %vm836_vm1, %v1452_v54  ;;  %v1456_v15 = vmul.f32 %v3404_v31, %v4152_v39 }
 0x23d   : > { %v1310_v46 = vpop.xlane.xlu1 %1309  ;;  %v1307_v56 = vpop.xlane.xlu0 %1306  ;;  %v1454_v20 = vmul.f32 %v3406_v45, %v4149_v60 }
 0x23e   : > { %3419 = vrcp.f32 %v1310_v46 }
 0x23f   : > { %v3408_v41 = vpop.eup %3407  ;;  %3421 = vrcp.f32 %v1307_v56  ;;  %3081 = vmatprep.mubr.msk.f32.mxu1 %vm836_vm1, %v1454_v20 }
 0x240   : > { %v3410_v5 = vpop.eup %3409  ;;  %3082 = vmatmul.mubr.msk.f32.gmra.mxu1 %vm836_vm1, %v1456_v15  ;;  %v1460_v26 = vmul.f32 %v3408_v41, %v4162_v4 }
 0x241   : > { %v1316_v23 = vpop.xlane.xlu1 %1315  ;;  %v1313_v17 = vpop.xlane.xlu0 %1312  ;;  %v1458_v7 = vmul.f32 %v3410_v5, %v4159_v24 }
 0x242   : > { %3423 = vrcp.f32 %v1316_v23 }
 0x243   : > { %v3412_v39 = vpop.eup %3411  ;;  %3425 = vrcp.f32 %v1313_v17  ;;  %3084 = vmatprep.mubr.msk.f32.mxu1 %vm836_vm1, %v1458_v7 }
 0x244   : > { %v3414_v60 = vpop.eup %3413  ;;  %3085 = vmatmul.mubr.msk.f32.gmra.mxu1 %vm836_vm1, %v1460_v26  ;;  %v1464_v38 = vmul.f32 %v3412_v39, %v4172_v9 }
 0x245   : > { %v1322_v58 = vpop.xlane.xlu1 %1321  ;;  %v1319_v32 = vpop.xlane.xlu0 %1318  ;;  %v1462_v27 = vmul.f32 %v3414_v60, %v4169_v28 }
 0x246   : > { %3427 = vrcp.f32 %v1322_v58 }
 0x247   : > { %v3416_v4 = vpop.eup %3415  ;;  %3429 = vrcp.f32 %v1319_v32  ;;  %3087 = vmatprep.mubr.msk.f32.mxu1 %vm836_vm1, %v1462_v27 }
 0x248   : > { %v3418_v24 = vpop.eup %3417  ;;  %3088 = vmatmul.mubr.msk.f32.gmra.mxu1 %vm836_vm1, %v1464_v38  ;;  %v1468_v52 = vmul.f32 %v3416_v4, %v4182_v19 }
 0x249   : > { %v1328_v13 = vpop.xlane.xlu1 %1327  ;;  %v1325_v6 = vpop.xlane.xlu0 %1324  ;;  %v1466_v12 = vmul.f32 %v3418_v24, %v4179_v25 }
 0x24a   : > { %3431 = vrcp.f32 %v1328_v13 }
 0x24b   : > { %v3420_v9 = vpop.eup %3419  ;;  %3433 = vrcp.f32 %v1325_v6  ;;  %3090 = vmatprep.mubr.msk.f32.mxu1 %vm836_vm1, %v1466_v12 }
 0x24c   : > { %v3422_v28 = vpop.eup %3421  ;;  %3091 = vmatmul.mubr.msk.f32.gmra.mxu1 %vm836_vm1, %v1468_v52  ;;  %v1472_v30 = vmul.f32 %v3420_v9, %v4192_v49 }
 0x24d   : > { %v1334_v40 = vpop.xlane.xlu1 %1333  ;;  %v1331_v2 = vpop.xlane.xlu0 %1330  ;;  %v1470_v63 = vmul.f32 %v3422_v28, %v4189_v29 }
 0x24e   : > { %3435 = vrcp.f32 %v1334_v40 }
 0x24f   : > { %v3424_v19 = vpop.eup %3423  ;;  %3437 = vrcp.f32 %v1331_v2  ;;  %3093 = vmatprep.mubr.msk.f32.mxu1 %vm836_vm1, %v1470_v63  ;;  %v4899_v2 = vld [vmem:[#allocation6_spill] sm:$0xff] }
 0x250   : > { %v3426_v25 = vpop.eup %3425  ;;  %3094 = vmatmul.mubr.msk.f32.gmra.mxu1 %vm836_vm1, %v1472_v30  ;;  %v1476_v21 = vmul.f32 %v3424_v19, %v4202_v53  ;;  %v4898_v30 = vld [vmem:[#allocation4_spill] sm:$0xff] }
 0x251   : > { %v1340_v44 = vpop.xlane.xlu1 %1339  ;;  %v1337_v59 = vpop.xlane.xlu0 %1336  ;;  %v1474_v33 = vmul.f32 %v3426_v25, %v4199_v47 }
 0x252   : > { %3439 = vrcp.f32 %v1340_v44 }
 0x253   : > { %v3428_v49 = vpop.eup %3427  ;;  %3441 = vrcp.f32 %v1337_v59  ;;  %3096 = vmatprep.mubr.msk.f32.mxu1 %vm836_vm1, %v1474_v33  ;;  %v4901_v33 = vld [vmem:[#allocation8_spill] sm:$0xff] }
 0x254   : > { %v3430_v29 = vpop.eup %3429  ;;  %3097 = vmatmul.mubr.msk.f32.gmra.mxu1 %vm836_vm1, %v1476_v21  ;;  %v1480_v35 = vmul.f32 %v3428_v49, %v4212_v57  ;;  %v4900_v21 = vld [vmem:[#allocation3_spill] sm:$0xff] }
 0x255   : > { %v1346_v54 = vpop.xlane.xlu1 %1345  ;;  %v1343_v62 = vpop.xlane.xlu0 %1342  ;;  %v1478_v14 = vmul.f32 %v3430_v29, %v4209_v37 }
 0x256   : > { %3443 = vrcp.f32 %v1346_v54  ;;  %v4902_v54 = vld [vmem:[#allocation5_spill] sm:$0xff] }
 0x257   : > { %v3432_v53 = vpop.eup %3431  ;;  %3445 = vrcp.f32 %v1343_v62  ;;  %3099 = vmatprep.mubr.msk.f32.mxu1 %vm836_vm1, %v1478_v14 }
 0x258   : > { %v3434_v47 = vpop.eup %3433  ;;  %3100 = vmatmul.mubr.msk.f32.gmra.mxu1 %vm836_vm1, %v1480_v35  ;;  %v1484_v16 = vmul.f32 %v3432_v53, %v4222_v61 }
 0x259   : > { %v1352_v31 = vpop.xlane.xlu1 %1351  ;;  %v1349_v45 = vpop.xlane.xlu0 %1348  ;;  %v1482_v15 = vmul.f32 %v3434_v47, %v4219_v8 }
 0x25a   : > { %3447 = vrcp.f32 %v1352_v31 }
 0x25b   : > { %v3436_v57 = vpop.eup %3435  ;;  %3449 = vrcp.f32 %v1349_v45  ;;  %3102 = vmatprep.mubr.msk.f32.mxu1 %vm836_vm1, %v1482_v15 }
 0x25c   : > { %v3438_v37 = vpop.eup %3437  ;;  %3103 = vmatmul.mubr.msk.f32.gmra.mxu1 %vm836_vm1, %v1484_v16  ;;  %v1488_v46 = vmul.f32 %v3436_v57, %v4232_v1 }
 0x25d   : > { %v1358_v56 = vpop.xlane.xlu1 %1357  ;;  %v1355_v20 = vpop.xlane.xlu0 %1354  ;;  %v1486_v41 = vmul.f32 %v3438_v37, %v4229_v48 }
 0x25e   : > { %3451 = vrcp.f32 %v1358_v56 }
 0x25f   : > { %v3440_v61 = vpop.eup %3439  ;;  %3453 = vrcp.f32 %v1355_v20  ;;  %3105 = vmatprep.mubr.msk.f32.mxu1 %vm836_vm1, %v1486_v41  ;;  %v4903_v41 = vld [vmem:[#allocation10_spill] sm:$0xff] }
 0x260   : > { %v3442_v8 = vpop.eup %3441  ;;  %3106 = vmatmul.mubr.msk.f32.gmra.mxu1 %vm836_vm1, %v1488_v46  ;;  %v1492_v5 = vmul.f32 %v3440_v61, %v4242_v10 }
 0x261   : > { %v1364_v26 = vpop.xlane.xlu1 %1363  ;;  %v1361_v23 = vpop.xlane.xlu0 %1360  ;;  %v1490_v17 = vmul.f32 %v3442_v8, %v4239_v43  ;;  %v4904_v8 = vld [vmem:[#allocation7_spill] sm:$0xff] }
 0x262   : > { %3455 = vrcp.f32 %v1364_v26 }
 0x263   : > { %v3444_v1 = vpop.eup %3443  ;;  %3457 = vrcp.f32 %v1361_v23  ;;  %3108 = vmatprep.mubr.msk.f32.mxu1 %vm836_vm1, %v1490_v17  ;;  %v4905_v23 = vld [vmem:[#allocation12_spill] sm:$0xff]  ;;  %v4906_v17 = vld [vmem:[#allocation9_spill] sm:$0xff] }
 0x264   : > { %v3446_v48 = vpop.eup %3445  ;;  %3109 = vmatmul.mubr.msk.f32.gmra.mxu1 %vm836_vm1, %v1492_v5  ;;  %v1496_v7 = vmul.f32 %v3444_v1, %v4252_v18 }
 0x265   : > { %v1370_v39 = vpop.xlane.xlu1 %1369  ;;  %v1367_v60 = vpop.xlane.xlu0 %1366  ;;  %v1494_v38 = vmul.f32 %v3446_v48, %v4249_v55 }
 0x266   : > { %3459 = vrcp.f32 %v1370_v39  ;;  %v4907_v39 = vld [vmem:[#allocation14_spill] sm:$0xff] }
 0x267   : > { %v3448_v10 = vpop.eup %3447  ;;  %3461 = vrcp.f32 %v1367_v60  ;;  %3111 = vmatprep.mubr.msk.f32.mxu1 %vm836_vm1, %v1494_v38  ;;  %v4908_v38 = vld [vmem:[#allocation11_spill] sm:$0xff] }
 0x268   : > { %v3450_v43 = vpop.eup %3449  ;;  %3112 = vmatmul.mubr.msk.f32.gmra.mxu1 %vm836_vm1, %v1496_v7  ;;  %v1500_v58 = vmul.f32 %v3448_v10, %v4262_v36 }
 0x269   : > { %v1376_v32 = vpop.xlane.xlu1 %1375  ;;  %v1373_v27 = vpop.xlane.xlu0 %1372  ;;  %v1498_v4 = vmul.f32 %v3450_v43, %v4259_v51 }
 0x26a   : > { %3463 = vrcp.f32 %v1376_v32  ;;  %v4909_v32 = vld [vmem:[#allocation16_spill] sm:$0xff] }
 0x26b   : > { %v3452_v18 = vpop.eup %3451  ;;  %3465 = vrcp.f32 %v1373_v27  ;;  %3114 = vmatprep.mubr.msk.f32.mxu1 %vm836_vm1, %v1498_v4  ;;  %v4910_v4 = vld [vmem:[#allocation13_spill] sm:$0xff] }
 0x26c   : > { %v3454_v55 = vpop.eup %3453  ;;  %3115 = vmatmul.mubr.msk.f32.gmra.mxu1 %vm836_vm1, %v1500_v58  ;;  %v1504_v24 = vmul.f32 %v3452_v18, %v4272_v0 }
 0x26d   : > { %v1382_v52 = vpop.xlane.xlu1 %1381  ;;  %v1379_v13 = vpop.xlane.xlu0 %1378  ;;  %v1502_v6 = vmul.f32 %v3454_v55, %v4269_v22 }
 0x26e   : > { %3467 = vrcp.f32 %v1382_v52 }
 0x26f   : > { %v3456_v36 = vpop.eup %3455  ;;  %3469 = vrcp.f32 %v1379_v13  ;;  %3117 = vmatprep.mubr.msk.f32.mxu1 %vm836_vm1, %v1502_v6 }
 0x270   : > { %v3458_v51 = vpop.eup %3457  ;;  %3118 = vmatmul.mubr.msk.f32.gmra.mxu1 %vm836_vm1, %v1504_v24  ;;  %v1508_v12 = vmul.f32 %v3456_v36, %v4282_v11 }
 0x271   : > { %v1388_v9 = vpop.xlane.xlu1 %1387  ;;  %v1385_v28 = vpop.xlane.xlu0 %1384  ;;  %v1506_v40 = vmul.f32 %v3458_v51, %v4898_v30 }
 0x272   : > { %3471 = vrcp.f32 %v1388_v9 }
 0x273   : > { %v3460_v0 = vpop.eup %3459  ;;  %3473 = vrcp.f32 %v1385_v28  ;;  %3120 = vmatprep.mubr.msk.f32.mxu1 %vm836_vm1, %v1506_v40 }
 0x274   : > { %v3462_v22 = vpop.eup %3461  ;;  %3121 = vmatmul.mubr.msk.f32.gmra.mxu1 %vm836_vm1, %v1508_v12  ;;  %v1512_v63 = vmul.f32 %v3460_v0, %v4899_v2 }
 0x275   : > { %v1394_v19 = vpop.xlane.xlu1 %1393  ;;  %v1391_v25 = vpop.xlane.xlu0 %1390  ;;  %v1510_v44 = vmul.f32 %v3462_v22, %v4900_v21 }
 0x276   : > { %3475 = vrcp.f32 %v1394_v19 }
 0x277   : > { %v3464_v11 = vpop.eup %3463  ;;  %3477 = vrcp.f32 %v1391_v25  ;;  %3123 = vmatprep.mubr.msk.f32.mxu1 %vm836_vm1, %v1510_v44 }
 0x278   : > { %v3466_v59 = vpop.eup %3465  ;;  %3124 = vmatmul.mubr.msk.f32.gmra.mxu1 %vm836_vm1, %v1512_v63  ;;  %v1516_v49 = vmul.f32 %v3464_v11, %v4901_v33 }
 0x279   : > { %v1400_v29 = vpop.xlane.xlu1 %1399  ;;  %v1397_v35 = vpop.xlane.xlu0 %1396  ;;  %v1514_v62 = vmul.f32 %v3466_v59, %v4902_v54 }
 0x27a   : > { %3479 = vrcp.f32 %v1400_v29 }
 0x27b   : > { %v3468_v14 = vpop.eup %3467  ;;  %3481 = vrcp.f32 %v1397_v35  ;;  %3126 = vmatprep.mubr.msk.f32.mxu1 %vm836_vm1, %v1514_v62 }
 0x27c   : > { %v3470_v53 = vpop.eup %3469  ;;  %3127 = vmatmul.mubr.msk.f32.gmra.mxu1 %vm836_vm1, %v1516_v49  ;;  %v1520_v47 = vmul.f32 %v3468_v14, %v4312_v34 }
 0x27d   : > { %v1406_v16 = vpop.xlane.xlu1 %1405  ;;  %v1403_v31 = vpop.xlane.xlu0 %1402  ;;  %v1518_v45 = vmul.f32 %v3470_v53, %v4309_v3 }
 0x27e   : > { %3483 = vrcp.f32 %v1406_v16 }
 0x27f   : > { %v3472_v15 = vpop.eup %3471  ;;  %3485 = vrcp.f32 %v1403_v31  ;;  %3129 = vmatprep.mubr.msk.f32.mxu1 %vm836_vm1, %v1518_v45 }
 0x280   : > { %v3474_v57 = vpop.eup %3473  ;;  %3130 = vmatmul.mubr.msk.f32.gmra.mxu1 %vm836_vm1, %v1520_v47  ;;  %v1524_v37 = vmul.f32 %v3472_v15, %v4322_v50 }
 0x281   : > { %v1412_v46 = vpop.xlane.xlu1 %1411  ;;  %v1409_v56 = vpop.xlane.xlu0 %1408  ;;  %v1522_v20 = vmul.f32 %v3474_v57, %v4319_v42 }
 0x282   : > { %3487 = vrcp.f32 %v1412_v46 }
 0x283   : > { %v3476_v34 = vpop.eup %3475  ;;  %3489 = vrcp.f32 %v1409_v56  ;;  %3132 = vmatprep.mubr.msk.f32.mxu1 %vm836_vm1, %v1522_v20 }
 0x284   : > { %v3478_v3 = vpop.eup %3477  ;;  %3133 = vmatmul.mubr.msk.f32.gmra.mxu1 %vm836_vm1, %v1524_v37  ;;  %v1528_v61 = vmul.f32 %v3476_v34, %v4903_v41 }
 0x285   : > { %v1526_v5 = vmul.f32 %v3478_v3, %v4904_v8 }
 0x287   : > { %v3480_v26 = vpop.eup %3479  ;;  %3135 = vmatprep.mubr.msk.f32.mxu1 %vm836_vm1, %v1526_v5 }
 0x288   : > { %v3482_v50 = vpop.eup %3481  ;;  %3136 = vmatmul.mubr.msk.f32.gmra.mxu1 %vm836_vm1, %v1528_v61  ;;  %v1532_v42 = vmul.f32 %v3480_v26, %v4905_v23 }
 0x289   : > { %v1530_v1 = vmul.f32 %v3482_v50, %v4906_v17 }
 0x28b   : > { %v3484_v48 = vpop.eup %3483  ;;  %3138 = vmatprep.mubr.msk.f32.mxu1 %vm836_vm1, %v1530_v1 }
 0x28c   : > { %v3486_v7 = vpop.eup %3485  ;;  %3139 = vmatmul.mubr.msk.f32.gmra.mxu1 %vm836_vm1, %v1532_v42  ;;  %v1536_v60 = vmul.f32 %v3484_v48, %v4907_v39 }
 0x28d   : > { %v1534_v10 = vmul.f32 %v3486_v7, %v4908_v38 }
 0x28f   : > { %v3488_v43 = vpop.eup %3487  ;;  %3141 = vmatprep.mubr.msk.f32.mxu1 %vm836_vm1, %v1534_v10 }
 0x290   : > { %v3490_v58 = vpop.eup %3489  ;;  %3142 = vmatmul.mubr.msk.f32.gmra.mxu1 %vm836_vm1, %v1536_v60  ;;  %v1540_v27 = vmul.f32 %v3488_v43, %v4909_v32 }
 0x291   : > { %v1538_v18 = vmul.f32 %v3490_v58, %v4910_v4 }
 0x293   : > { %3144 = vmatprep.mubr.msk.f32.mxu1 %vm836_vm1, %v1538_v18 }
 0x294   : > { %3145 = vmatmul.mubr.msk.f32.gmra.mxu1 %vm836_vm1, %v1540_v27 }
 0x2d7   : > { %v3053_v55 = vpop.f32.mrf.mxu1 }
 0x2d8   : > { %2123 = vst.msk [vmem:[%s4489_s18 + $0x8] sm:$0xff] %vm836_vm1, %v3053_v55 }
 0x2d9   : > { %v1803_v24 = vpop.f32.mrf.mxu1 }
 0x2da   : > { %2122 = vst.msk [vmem:[%s4489_s18] sm:$0xff] %vm836_vm1, %v1803_v24 }
 0x2db   : > { %v3056_v52 = vpop.f32.mrf.mxu1 }
 0x2dc   : > { %2125 = vst.msk [vmem:[%s4489_s18 + $0x18] sm:$0xff] %vm836_vm1, %v3056_v52 }
 0x2dd   : > { %v1813_v13 = vpop.f32.mrf.mxu1 }
 0x2de   : > { %2124 = vst.msk [vmem:[%s4489_s18 + $0x10] sm:$0xff] %vm836_vm1, %v1813_v13 }
 0x2e0   : > { %v3059_v6 = vpop.f32.mrf.mxu1 }
 0x2e1   : > { %2127 = vst.msk [vmem:[%s4489_s18 + $0x28] sm:$0xff] %vm836_vm1, %v3059_v6 }
 0x2e2   : > { %v1823_v36 = vpop.f32.mrf.mxu1 }
 0x2e3   : > { %2126 = vst.msk [vmem:[%s4489_s18 + $0x20] sm:$0xff] %vm836_vm1, %v1823_v36 }
 0x2e4   : > { %v3062_v51 = vpop.f32.mrf.mxu1 }
 0x2e5   : > { %2129 = vst.msk [vmem:[%s4489_s18 + $0x38] sm:$0xff] %vm836_vm1, %v3062_v51 }
 0x2e6   : > { %v1833_v12 = vpop.f32.mrf.mxu1 }
 0x2e7   : > { %2128 = vst.msk [vmem:[%s4489_s18 + $0x30] sm:$0xff] %vm836_vm1, %v1833_v12 }
 0x2e8   : > { %v3065_v9 = vpop.f32.mrf.mxu1 }
 0x2e9   : > { %2131 = vst.msk [vmem:[%s4489_s18 + $0x48] sm:$0xff] %vm836_vm1, %v3065_v9 }
 0x2ea   : > { %v1843_v28 = vpop.f32.mrf.mxu1 }
 0x2eb   : > { %2130 = vst.msk [vmem:[%s4489_s18 + $0x40] sm:$0xff] %vm836_vm1, %v1843_v28 }
 0x2ec   : > { %v3068_v30 = vpop.f32.mrf.mxu1 }
 0x2ed   : > { %2133 = vst.msk [vmem:[%s4489_s18 + $0x58] sm:$0xff] %vm836_vm1, %v3068_v30 }
 0x2ee   : > { %v1853_v40 = vpop.f32.mrf.mxu1 }
 0x2ef   : > { %2132 = vst.msk [vmem:[%s4489_s18 + $0x50] sm:$0xff] %vm836_vm1, %v1853_v40 }
 0x2f0   : > { %v3071_v0 = vpop.f32.mrf.mxu1 }
 0x2f1   : > { %2135 = vst.msk [vmem:[%s4489_s18 + $0x68] sm:$0xff] %vm836_vm1, %v3071_v0 }
 0x2f2   : > { %v1863_v22 = vpop.f32.mrf.mxu1 }
 0x2f3   : > { %2134 = vst.msk [vmem:[%s4489_s18 + $0x60] sm:$0xff] %vm836_vm1, %v1863_v22 }
 0x2f4   : > { %v3074_v2 = vpop.f32.mrf.mxu1 }
 0x2f5   : > { %2137 = vst.msk [vmem:[%s4489_s18 + $0x78] sm:$0xff] %vm836_vm1, %v3074_v2 }
 0x2f6   : > { %v1873_v63 = vpop.f32.mrf.mxu1 }
 0x2f7   : > { %2136 = vst.msk [vmem:[%s4489_s18 + $0x70] sm:$0xff] %vm836_vm1, %v1873_v63 }
 0x2f8   : > { %v3077_v19 = vpop.f32.mrf.mxu1 }
 0x2f9   : > { %2139 = vst.msk [vmem:[%s4489_s18 + $0x88] sm:$0xff] %vm836_vm1, %v3077_v19 }
 0x2fa   : > { %v1883_v25 = vpop.f32.mrf.mxu1 }
 0x2fb   : > { %2138 = vst.msk [vmem:[%s4489_s18 + $0x80] sm:$0xff] %vm836_vm1, %v1883_v25 }
 0x2fc   : > { %v3080_v21 = vpop.f32.mrf.mxu1 }
 0x2fd   : > { %2141 = vst.msk [vmem:[%s4489_s18 + $0x98] sm:$0xff] %vm836_vm1, %v3080_v21 }
 0x2fe   : > { %v1893_v44 = vpop.f32.mrf.mxu1 }
 0x2ff   : > { %2140 = vst.msk [vmem:[%s4489_s18 + $0x90] sm:$0xff] %vm836_vm1, %v1893_v44 }
 0x300   : > { %v3083_v11 = vpop.f32.mrf.mxu1 }
 0x301   : > { %2143 = vst.msk [vmem:[%s4489_s18 + $0xa8] sm:$0xff] %vm836_vm1, %v3083_v11 }
 0x302   : > { %v1903_v59 = vpop.f32.mrf.mxu1 }
 0x303   : > { %2142 = vst.msk [vmem:[%s4489_s18 + $0xa0] sm:$0xff] %vm836_vm1, %v1903_v59 }
 0x304   : > { %v3086_v33 = vpop.f32.mrf.mxu1 }
 0x305   : > { %2145 = vst.msk [vmem:[%s4489_s18 + $0xb8] sm:$0xff] %vm836_vm1, %v3086_v33 }
 0x306   : > { %v1913_v49 = vpop.f32.mrf.mxu1 }
 0x307   : > { %2144 = vst.msk [vmem:[%s4489_s18 + $0xb0] sm:$0xff] %vm836_vm1, %v1913_v49 }
 0x308   : > { %v3089_v29 = vpop.f32.mrf.mxu1 }
 0x309   : > { %2147 = vst.msk [vmem:[%s4489_s18 + $0xc8] sm:$0xff] %vm836_vm1, %v3089_v29 }
 0x30a   : > { %v1923_v35 = vpop.f32.mrf.mxu1 }
 0x30b   : > { %2146 = vst.msk [vmem:[%s4489_s18 + $0xc0] sm:$0xff] %vm836_vm1, %v1923_v35 }
 0x30c   : > { %v3092_v54 = vpop.f32.mrf.mxu1 }
 0x30d   : > { %2149 = vst.msk [vmem:[%s4489_s18 + $0xd8] sm:$0xff] %vm836_vm1, %v3092_v54 }
 0x30e   : > { %v1933_v62 = vpop.f32.mrf.mxu1 }
 0x30f   : > { %2148 = vst.msk [vmem:[%s4489_s18 + $0xd0] sm:$0xff] %vm836_vm1, %v1933_v62 }
 0x310   : > { %v3095_v14 = vpop.f32.mrf.mxu1 }
 0x311   : > { %2151 = vst.msk [vmem:[%s4489_s18 + $0xe8] sm:$0xff] %vm836_vm1, %v3095_v14 }
 0x312   : > { %v1943_v53 = vpop.f32.mrf.mxu1 }
 0x313   : > { %2150 = vst.msk [vmem:[%s4489_s18 + $0xe0] sm:$0xff] %vm836_vm1, %v1943_v53 }
 0x314   : > { %v3098_v47 = vpop.f32.mrf.mxu1 }
 0x315   : > { %2153 = vst.msk [vmem:[%s4489_s18 + $0xf8] sm:$0xff] %vm836_vm1, %v3098_v47 }
 0x316   : > { %v1953_v16 = vpop.f32.mrf.mxu1 }
 0x317   : > { %2152 = vst.msk [vmem:[%s4489_s18 + $0xf0] sm:$0xff] %vm836_vm1, %v1953_v16 }
 0x318   : > { %v3101_v31 = vpop.f32.mrf.mxu1 }
 0x319   : > { %2155 = vst.msk [vmem:[%s4489_s18 + $0x108] sm:$0xff] %vm836_vm1, %v3101_v31 }
 0x31a   : > { %v1963_v45 = vpop.f32.mrf.mxu1 }
 0x31b   : > { %2154 = vst.msk [vmem:[%s4489_s18 + $0x100] sm:$0xff] %vm836_vm1, %v1963_v45 }
 0x31c   : > { %v3104_v15 = vpop.f32.mrf.mxu1 }
 0x31d   : > { %2157 = vst.msk [vmem:[%s4489_s18 + $0x118] sm:$0xff] %vm836_vm1, %v3104_v15 }
 0x31e   : > { %v1973_v57 = vpop.f32.mrf.mxu1 }
 0x31f   : > { %2156 = vst.msk [vmem:[%s4489_s18 + $0x110] sm:$0xff] %vm836_vm1, %v1973_v57 }
 0x320   : > { %v3107_v37 = vpop.f32.mrf.mxu1 }
 0x321   : > { %2159 = vst.msk [vmem:[%s4489_s18 + $0x128] sm:$0xff] %vm836_vm1, %v3107_v37 }
 0x322   : > { %v1983_v46 = vpop.f32.mrf.mxu1 }
 0x323   : > { %2158 = vst.msk [vmem:[%s4489_s18 + $0x120] sm:$0xff] %vm836_vm1, %v1983_v46 }
 0x324   : > { %v3110_v56 = vpop.f32.mrf.mxu1 }
 0x325   : > { %2161 = vst.msk [vmem:[%s4489_s18 + $0x138] sm:$0xff] %vm836_vm1, %v3110_v56 }
 0x326   : > { %v1993_v20 = vpop.f32.mrf.mxu1 }
 0x327   : > { %2160 = vst.msk [vmem:[%s4489_s18 + $0x130] sm:$0xff] %vm836_vm1, %v1993_v20 }
 0x328   : > { %v3113_v34 = vpop.f32.mrf.mxu1 }
 0x329   : > { %2163 = vst.msk [vmem:[%s4489_s18 + $0x148] sm:$0xff] %vm836_vm1, %v3113_v34 }
 0x32a   : > { %v2003_v3 = vpop.f32.mrf.mxu1 }
 0x32b   : > { %2162 = vst.msk [vmem:[%s4489_s18 + $0x140] sm:$0xff] %vm836_vm1, %v2003_v3 }
 0x32c   : > { %v3116_v41 = vpop.f32.mrf.mxu1 }
 0x32d   : > { %2165 = vst.msk [vmem:[%s4489_s18 + $0x158] sm:$0xff] %vm836_vm1, %v3116_v41 }
 0x32e   : > { %v2013_v61 = vpop.f32.mrf.mxu1 }
 0x32f   : > { %2164 = vst.msk [vmem:[%s4489_s18 + $0x150] sm:$0xff] %vm836_vm1, %v2013_v61 }
 0x330   : > { %v3119_v8 = vpop.f32.mrf.mxu1 }
 0x331   : > { %2167 = vst.msk [vmem:[%s4489_s18 + $0x168] sm:$0xff] %vm836_vm1, %v3119_v8 }
 0x332   : > { %v2023_v5 = vpop.f32.mrf.mxu1 }
 0x333   : > { %2166 = vst.msk [vmem:[%s4489_s18 + $0x160] sm:$0xff] %vm836_vm1, %v2023_v5 }
 0x334   : > { %v3122_v26 = vpop.f32.mrf.mxu1 }
 0x335   : > { %2169 = vst.msk [vmem:[%s4489_s18 + $0x178] sm:$0xff] %vm836_vm1, %v3122_v26 }
 0x336   : > { %v2033_v50 = vpop.f32.mrf.mxu1 }
 0x337   : > { %2168 = vst.msk [vmem:[%s4489_s18 + $0x170] sm:$0xff] %vm836_vm1, %v2033_v50 }
 0x338   : > { %v3125_v23 = vpop.f32.mrf.mxu1 }
 0x339   : > { %2171 = vst.msk [vmem:[%s4489_s18 + $0x188] sm:$0xff] %vm836_vm1, %v3125_v23 }
 0x33a   : > { %v2043_v42 = vpop.f32.mrf.mxu1 }
 0x33b   : > { %2170 = vst.msk [vmem:[%s4489_s18 + $0x180] sm:$0xff] %vm836_vm1, %v2043_v42 }
 0x33c   : > { %v3128_v17 = vpop.f32.mrf.mxu1 }
 0x33d   : > { %2173 = vst.msk [vmem:[%s4489_s18 + $0x198] sm:$0xff] %vm836_vm1, %v3128_v17 }
 0x33e   : > { %v2053_v1 = vpop.f32.mrf.mxu1 }
 0x33f   : > { %2172 = vst.msk [vmem:[%s4489_s18 + $0x190] sm:$0xff] %vm836_vm1, %v2053_v1 }
 0x340   : > { %v3131_v48 = vpop.f32.mrf.mxu1 }
 0x341   : > { %2175 = vst.msk [vmem:[%s4489_s18 + $0x1a8] sm:$0xff] %vm836_vm1, %v3131_v48 }
 0x342   : > { %v2063_v7 = vpop.f32.mrf.mxu1 }
 0x343   : > { %2174 = vst.msk [vmem:[%s4489_s18 + $0x1a0] sm:$0xff] %vm836_vm1, %v2063_v7 }
 0x344   : > { %v3134_v39 = vpop.f32.mrf.mxu1 }
 0x345   : > { %2177 = vst.msk [vmem:[%s4489_s18 + $0x1b8] sm:$0xff] %vm836_vm1, %v3134_v39 }
 0x346   : > { %v2073_v60 = vpop.f32.mrf.mxu1 }
 0x347   : > { %2176 = vst.msk [vmem:[%s4489_s18 + $0x1b0] sm:$0xff] %vm836_vm1, %v2073_v60 }
 0x348   : > { %v3137_v38 = vpop.f32.mrf.mxu1 }
 0x349   : > { %2179 = vst.msk [vmem:[%s4489_s18 + $0x1c8] sm:$0xff] %vm836_vm1, %v3137_v38 }
 0x34a   : > { %v2083_v10 = vpop.f32.mrf.mxu1 }
 0x34b   : > { %2178 = vst.msk [vmem:[%s4489_s18 + $0x1c0] sm:$0xff] %vm836_vm1, %v2083_v10 }
 0x34c   : > { %v3140_v43 = vpop.f32.mrf.mxu1 }
 0x34d   : > { %2181 = vst.msk [vmem:[%s4489_s18 + $0x1d8] sm:$0xff] %vm836_vm1, %v3140_v43 }
 0x34e   : > { %v2093_v58 = vpop.f32.mrf.mxu1 }
 0x34f   : > { %2180 = vst.msk [vmem:[%s4489_s18 + $0x1d0] sm:$0xff] %vm836_vm1, %v2093_v58 }
 0x350   : > { %v3143_v32 = vpop.f32.mrf.mxu1 }
 0x351   : > { %2183 = vst.msk [vmem:[%s4489_s18 + $0x1e8] sm:$0xff] %vm836_vm1, %v3143_v32 }
 0x352   : > { %v2103_v27 = vpop.f32.mrf.mxu1 }
 0x353   : > { %2182 = vst.msk [vmem:[%s4489_s18 + $0x1e0] sm:$0xff] %vm836_vm1, %v2103_v27  ;;  %2192 = sbr.rel (!%p3624_p4) target bundleno = 920 (0x398), region = 36 }
 0x354   : > { %v3146_v4 = vpop.f32.mrf.mxu1 }
 0x355   : > { %2185 = vst.msk [vmem:[%s4489_s18 + $0x1f8] sm:$0xff] %vm836_vm1, %v3146_v4 }
 0x356   : > { %v2113_v18 = vpop.f32.mrf.mxu1 }
 0x357   : > { %2184 = vst.msk [vmem:[%s4489_s18 + $0x1f0] sm:$0xff] %vm836_vm1, %v2113_v18 }
 0x358   : > { %s4920_s12 = smov (!%p2195_p8, %s2194_s12), 64 }
 0x359   : > { %s2791_s26 = sshll.u32 %s4920_s12, 7 }
 0x35a   : > { %p2794_p9 = scmp.eq.s32.totalorder %s2791_s26, 0 }
 0x35b   : > { %s4632_s27 = sshrl.u32 (!%p2794_p9), %s4920_s12, 6 }
 0x35c   : > { %2203 = sbr.rel (%p2794_p9) target bundleno = 920 (0x398), region = 40  ;;  %p2795_p10 = scmp.le.s32.totalorder (!%p2794_p9), %s4632_s27, 0 }
 0x361   : > { %2610 = sbr.rel (%p2795_p10) target bundleno = 903 (0x387), region = 116  ;;  %s4911_s15 = smov (!%p2795_p10), %s4626_s24 }
 0x362   : > { %s4912_s20 = smov (!%p2795_p10), %s4489_s18  ;;  %s4641_s25 = smov (!%p2795_p10), 0  }
 0x363   : > { %s4643_s28 = smov (!%p2795_p10), 0  }
 0x366 LB: >> { %v2392_v55 = vld [vmem:[%s3553_s20] sm:$0xff]  ;;  %v2394_v24 = vld [vmem:[%s3553_s20 + $0x8] sm:$0xff]  ;;  %v2396_v52 = vld [vmem:[%s3553_s20 + $0x10] sm:$0xff]  ;;  %s2520_s29 = sadd.s32 1, %s3557_s25  ;;  %s2386_s28 = sadd.s32 1, %s3561_s28   ;;  %s3561_s28 = sphi %s4643_s28, %s2386_s28   ;;  %s3557_s25 = sphi %s4641_s25, %s4915_s25   ;;  %s3553_s20 = sphi %s4912_s20, %s4914_s20   ;;  %s3549_s15 = sphi %s4911_s15, %s4913_s15  }
 0x367   : >> { %2393 = vst [vmem:[%s3549_s15] sm:$0xff] %v2392_v55  ;;  %2395 = vst [vmem:[%s3549_s15 + $0x8] sm:$0xff] %v2394_v24  ;;  %v2398_v13 = vld [vmem:[%s3553_s20 + $0x18] sm:$0xff]  ;;  %v2400_v6 = vld [vmem:[%s3553_s20 + $0x20] sm:$0xff]  ;;  %p2521_p11 = scmp.ge.s32.totalorder %s2520_s29, %s4632_s27  ;;  %p2385_p12 = scmp.ge.s32.totalorder %s2386_s28, %s4632_s27 }
 0x368   : >> { %2397 = vst [vmem:[%s3549_s15 + $0x10] sm:$0xff] %v2396_v52  ;;  %v2402_v36 = vld [vmem:[%s3553_s20 + $0x28] sm:$0xff]  ;;  %2399 = vst [vmem:[%s3549_s15 + $0x18] sm:$0xff] %v2398_v13  ;;  %v2404_v51 = vld [vmem:[%s3553_s20 + $0x30] sm:$0xff] }
 0x369   : >> { %2401 = vst [vmem:[%s3549_s15 + $0x20] sm:$0xff] %v2400_v6  ;;  %2403 = vst [vmem:[%s3549_s15 + $0x28] sm:$0xff] %v2402_v36  ;;  %v2406_v12 = vld [vmem:[%s3553_s20 + $0x38] sm:$0xff]  ;;  %v2408_v9 = vld [vmem:[%s3553_s20 + $0x40] sm:$0xff]  ;;  %s4922_s29 = smov (%p2521_p11, %s2520_s29), 0 }
 0x36a   : >> { %2405 = vst [vmem:[%s3549_s15 + $0x30] sm:$0xff] %v2404_v51  ;;  %2407 = vst [vmem:[%s3549_s15 + $0x38] sm:$0xff] %v2406_v12  ;;  %v2410_v28 = vld [vmem:[%s3553_s20 + $0x48] sm:$0xff]  ;;  %v2412_v30 = vld [vmem:[%s3553_s20 + $0x50] sm:$0xff]  ;;  %s2796_s30 = sshll.u32 %s4922_s29, 9  ;;  %s4915_s25 = smov %s4922_s29 }
 0x36b   : >> { %2409 = vst [vmem:[%s3549_s15 + $0x40] sm:$0xff] %v2408_v9  ;;  %v2414_v40 = vld [vmem:[%s3553_s20 + $0x58] sm:$0xff]  ;;  %2411 = vst [vmem:[%s3549_s15 + $0x48] sm:$0xff] %v2410_v28  ;;  %v2416_v0 = vld [vmem:[%s3553_s20 + $0x60] sm:$0xff]  ;;  %s4699_s4 = scalar_lea.vmem %s4489_s18, %s2796_s30 [#allocation2]   ;;  %s4702_s5 = scalar_lea.vmem %s4626_s24, %s2796_s30  }
 0x36c   : >> { %2413 = vst [vmem:[%s3549_s15 + $0x50] sm:$0xff] %v2412_v30  ;;  %2415 = vst [vmem:[%s3549_s15 + $0x58] sm:$0xff] %v2414_v40  ;;  %v2418_v22 = vld [vmem:[%s3553_s20 + $0x68] sm:$0xff]  ;;  %v2420_v2 = vld [vmem:[%s3553_s20 + $0x70] sm:$0xff] }
 0x36d   : >> { %2417 = vst [vmem:[%s3549_s15 + $0x60] sm:$0xff] %v2416_v0  ;;  %2419 = vst [vmem:[%s3549_s15 + $0x68] sm:$0xff] %v2418_v22  ;;  %v2422_v63 = vld [vmem:[%s3553_s20 + $0x78] sm:$0xff]  ;;  %v2424_v19 = vld [vmem:[%s3553_s20 + $0x80] sm:$0xff] }
 0x36e   : >> { %2421 = vst [vmem:[%s3549_s15 + $0x70] sm:$0xff] %v2420_v2  ;;  %v2426_v25 = vld [vmem:[%s3553_s20 + $0x88] sm:$0xff]  ;;  %2423 = vst [vmem:[%s3549_s15 + $0x78] sm:$0xff] %v2422_v63  ;;  %v2428_v21 = vld [vmem:[%s3553_s20 + $0x90] sm:$0xff] }
 0x36f   : >> { %2425 = vst [vmem:[%s3549_s15 + $0x80] sm:$0xff] %v2424_v19  ;;  %2427 = vst [vmem:[%s3549_s15 + $0x88] sm:$0xff] %v2426_v25  ;;  %v2430_v44 = vld [vmem:[%s3553_s20 + $0x98] sm:$0xff]  ;;  %v2432_v11 = vld [vmem:[%s3553_s20 + $0xa0] sm:$0xff] }
 0x370   : >> { %2429 = vst [vmem:[%s3549_s15 + $0x90] sm:$0xff] %v2428_v21  ;;  %2431 = vst [vmem:[%s3549_s15 + $0x98] sm:$0xff] %v2430_v44  ;;  %v2434_v59 = vld [vmem:[%s3553_s20 + $0xa8] sm:$0xff]  ;;  %v2436_v33 = vld [vmem:[%s3553_s20 + $0xb0] sm:$0xff] }
 0x371   : >> { %2433 = vst [vmem:[%s3549_s15 + $0xa0] sm:$0xff] %v2432_v11  ;;  %v2438_v49 = vld [vmem:[%s3553_s20 + $0xb8] sm:$0xff]  ;;  %2435 = vst [vmem:[%s3549_s15 + $0xa8] sm:$0xff] %v2434_v59  ;;  %v2440_v29 = vld [vmem:[%s3553_s20 + $0xc0] sm:$0xff] }
 0x372   : >> { %2437 = vst [vmem:[%s3549_s15 + $0xb0] sm:$0xff] %v2436_v33  ;;  %2439 = vst [vmem:[%s3549_s15 + $0xb8] sm:$0xff] %v2438_v49  ;;  %v2442_v35 = vld [vmem:[%s3553_s20 + $0xc8] sm:$0xff]  ;;  %v2444_v54 = vld [vmem:[%s3553_s20 + $0xd0] sm:$0xff] }
 0x373   : >> { %2441 = vst [vmem:[%s3549_s15 + $0xc0] sm:$0xff] %v2440_v29  ;;  %2443 = vst [vmem:[%s3549_s15 + $0xc8] sm:$0xff] %v2442_v35  ;;  %v2446_v62 = vld [vmem:[%s3553_s20 + $0xd8] sm:$0xff]  ;;  %v2448_v14 = vld [vmem:[%s3553_s20 + $0xe0] sm:$0xff] }
 0x374   : >> { %2445 = vst [vmem:[%s3549_s15 + $0xd0] sm:$0xff] %v2444_v54  ;;  %v2450_v53 = vld [vmem:[%s3553_s20 + $0xe8] sm:$0xff]  ;;  %2447 = vst [vmem:[%s3549_s15 + $0xd8] sm:$0xff] %v2446_v62  ;;  %v2452_v47 = vld [vmem:[%s3553_s20 + $0xf0] sm:$0xff] }
 0x375   : >> { %2449 = vst [vmem:[%s3549_s15 + $0xe0] sm:$0xff] %v2448_v14  ;;  %2451 = vst [vmem:[%s3549_s15 + $0xe8] sm:$0xff] %v2450_v53  ;;  %v2454_v16 = vld [vmem:[%s3553_s20 + $0xf8] sm:$0xff]  ;;  %v2456_v31 = vld [vmem:[%s3553_s20 + $0x100] sm:$0xff] }
 0x376   : >> { %2453 = vst [vmem:[%s3549_s15 + $0xf0] sm:$0xff] %v2452_v47  ;;  %2455 = vst [vmem:[%s3549_s15 + $0xf8] sm:$0xff] %v2454_v16  ;;  %v2458_v45 = vld [vmem:[%s3553_s20 + $0x108] sm:$0xff]  ;;  %v2460_v15 = vld [vmem:[%s3553_s20 + $0x110] sm:$0xff] }
 0x377   : >> { %2457 = vst [vmem:[%s3549_s15 + $0x100] sm:$0xff] %v2456_v31  ;;  %v2462_v57 = vld [vmem:[%s3553_s20 + $0x118] sm:$0xff]  ;;  %2459 = vst [vmem:[%s3549_s15 + $0x108] sm:$0xff] %v2458_v45  ;;  %v2464_v37 = vld [vmem:[%s3553_s20 + $0x120] sm:$0xff] }
 0x378   : >> { %2461 = vst [vmem:[%s3549_s15 + $0x110] sm:$0xff] %v2460_v15  ;;  %2463 = vst [vmem:[%s3549_s15 + $0x118] sm:$0xff] %v2462_v57  ;;  %v2466_v46 = vld [vmem:[%s3553_s20 + $0x128] sm:$0xff]  ;;  %v2468_v56 = vld [vmem:[%s3553_s20 + $0x130] sm:$0xff] }
 0x379   : >> { %2465 = vst [vmem:[%s3549_s15 + $0x120] sm:$0xff] %v2464_v37  ;;  %2467 = vst [vmem:[%s3549_s15 + $0x128] sm:$0xff] %v2466_v46  ;;  %v2470_v20 = vld [vmem:[%s3553_s20 + $0x138] sm:$0xff]  ;;  %v2472_v34 = vld [vmem:[%s3553_s20 + $0x140] sm:$0xff] }
 0x37a   : >> { %2469 = vst [vmem:[%s3549_s15 + $0x130] sm:$0xff] %v2468_v56  ;;  %v2474_v3 = vld [vmem:[%s3553_s20 + $0x148] sm:$0xff]  ;;  %2471 = vst [vmem:[%s3549_s15 + $0x138] sm:$0xff] %v2470_v20  ;;  %v2476_v41 = vld [vmem:[%s3553_s20 + $0x150] sm:$0xff] }
 0x37b   : >> { %2473 = vst [vmem:[%s3549_s15 + $0x140] sm:$0xff] %v2472_v34  ;;  %2475 = vst [vmem:[%s3549_s15 + $0x148] sm:$0xff] %v2474_v3  ;;  %v2478_v61 = vld [vmem:[%s3553_s20 + $0x158] sm:$0xff]  ;;  %v2480_v8 = vld [vmem:[%s3553_s20 + $0x160] sm:$0xff] }
 0x37c   : >> { %2477 = vst [vmem:[%s3549_s15 + $0x150] sm:$0xff] %v2476_v41  ;;  %2479 = vst [vmem:[%s3549_s15 + $0x158] sm:$0xff] %v2478_v61  ;;  %v2482_v5 = vld [vmem:[%s3553_s20 + $0x168] sm:$0xff]  ;;  %v2484_v26 = vld [vmem:[%s3553_s20 + $0x170] sm:$0xff] }
 0x37d   : >> { %2481 = vst [vmem:[%s3549_s15 + $0x160] sm:$0xff] %v2480_v8  ;;  %v2486_v50 = vld [vmem:[%s3553_s20 + $0x178] sm:$0xff]  ;;  %2483 = vst [vmem:[%s3549_s15 + $0x168] sm:$0xff] %v2482_v5  ;;  %v2488_v23 = vld [vmem:[%s3553_s20 + $0x180] sm:$0xff] }
 0x37e   : >> { %2485 = vst [vmem:[%s3549_s15 + $0x170] sm:$0xff] %v2484_v26  ;;  %2487 = vst [vmem:[%s3549_s15 + $0x178] sm:$0xff] %v2486_v50  ;;  %v2490_v42 = vld [vmem:[%s3553_s20 + $0x188] sm:$0xff]  ;;  %v2492_v17 = vld [vmem:[%s3553_s20 + $0x190] sm:$0xff] }
 0x37f   : >> { %2489 = vst [vmem:[%s3549_s15 + $0x180] sm:$0xff] %v2488_v23  ;;  %2491 = vst [vmem:[%s3549_s15 + $0x188] sm:$0xff] %v2490_v42  ;;  %v2494_v1 = vld [vmem:[%s3553_s20 + $0x198] sm:$0xff]  ;;  %v2496_v48 = vld [vmem:[%s3553_s20 + $0x1a0] sm:$0xff] }
 0x380   : >> { %2493 = vst [vmem:[%s3549_s15 + $0x190] sm:$0xff] %v2492_v17  ;;  %v2498_v7 = vld [vmem:[%s3553_s20 + $0x1a8] sm:$0xff]  ;;  %2495 = vst [vmem:[%s3549_s15 + $0x198] sm:$0xff] %v2494_v1  ;;  %v2500_v39 = vld [vmem:[%s3553_s20 + $0x1b0] sm:$0xff] }
 0x381   : >> { %2497 = vst [vmem:[%s3549_s15 + $0x1a0] sm:$0xff] %v2496_v48  ;;  %2499 = vst [vmem:[%s3549_s15 + $0x1a8] sm:$0xff] %v2498_v7  ;;  %v2502_v60 = vld [vmem:[%s3553_s20 + $0x1b8] sm:$0xff]  ;;  %v2504_v38 = vld [vmem:[%s3553_s20 + $0x1c0] sm:$0xff] }
 0x382   : >> { %2501 = vst [vmem:[%s3549_s15 + $0x1b0] sm:$0xff] %v2500_v39  ;;  %2503 = vst [vmem:[%s3549_s15 + $0x1b8] sm:$0xff] %v2502_v60  ;;  %v2506_v10 = vld [vmem:[%s3553_s20 + $0x1c8] sm:$0xff]  ;;  %v2508_v43 = vld [vmem:[%s3553_s20 + $0x1d0] sm:$0xff]  ;;  %2388 = sbr.rel (!%p2385_p12) target bundleno = 870 (0x366), region = 122 }
 0x383   : >> { %2505 = vst [vmem:[%s3549_s15 + $0x1c0] sm:$0xff] %v2504_v38  ;;  %v2510_v58 = vld [vmem:[%s3553_s20 + $0x1d8] sm:$0xff]  ;;  %2507 = vst [vmem:[%s3549_s15 + $0x1c8] sm:$0xff] %v2506_v10  ;;  %v2512_v32 = vld [vmem:[%s3553_s20 + $0x1e0] sm:$0xff] }
 0x384   : >> { %2509 = vst [vmem:[%s3549_s15 + $0x1d0] sm:$0xff] %v2508_v43  ;;  %2511 = vst [vmem:[%s3549_s15 + $0x1d8] sm:$0xff] %v2510_v58  ;;  %v2514_v27 = vld [vmem:[%s3553_s20 + $0x1e8] sm:$0xff]  ;;  %v2516_v4 = vld [vmem:[%s3553_s20 + $0x1f0] sm:$0xff] }
 0x385   : >> { %2513 = vst [vmem:[%s3549_s15 + $0x1e0] sm:$0xff] %v2512_v32  ;;  %2515 = vst [vmem:[%s3549_s15 + $0x1e8] sm:$0xff] %v2514_v27  ;;  %v2518_v18 = vld [vmem:[%s3553_s20 + $0x1f8] sm:$0xff]  ;;  %s4914_s20 = smov %s4699_s4 }
 0x386   : >> { %2517 = vst [vmem:[%s3549_s15 + $0x1f0] sm:$0xff] %v2516_v4  ;;  %2519 = vst [vmem:[%s3549_s15 + $0x1f8] sm:$0xff] %v2518_v18  ;;  %s4913_s15 = smov %s4702_s5 }
 0x387 PF: > { %s4807_s6 = sand.u32 63, %s4920_s12   ;;  %s2807_s7 = sshll.u32 %s4632_s27, 9 }
 0x388   : > { %s2531_s8 = scalar_lea.vmem %s4489_s18, %s2807_s7 [#allocation2]   ;;  %s2533_s9 = scalar_lea.vmem %s4626_s24, %s2807_s7  }
 0x389   : > { %p2801_p13 = scmp.le.s32.totalorder %s4807_s6, 0 }
 0x38a   : > { %s3563_s10 = smov (!%p2801_p13), %s2533_s9   ;;  %s3567_s11 = smov (!%p2801_p13), %s2531_s8  }
 0x38b   : > { %2624 = sbr.rel (%p2801_p13) target bundleno = 920 (0x398), region = 127  ;;  %s3571_s14 = smov (!%p2801_p13), 0  }
 0x38c   : > { %s3575_s17 = smov (!%p2801_p13), 0  }
 0x390 LB: >> { %v2543_v55 = vld [vmem:[%s3569_s11] sm:$0xff]  ;;  %s2545_s12 = sadd.s32 1, %s3573_s14  ;;  %s2537_s17 = sadd.s32 1, %s3577_s17   ;;  %s3577_s17 = sphi %s3575_s17, %s2537_s17   ;;  %s3573_s14 = sphi %s3571_s14, %s3572_s14   ;;  %s3569_s11 = sphi %s3567_s11, %s2550_s11   ;;  %s3565_s10 = sphi %s3563_s10, %s2551_s10  }
 0x391   : >> { %2544 = vst [vmem:[%s3565_s10] sm:$0xff] %v2543_v55  ;;  %p2546_p0 = scmp.ge.s32.totalorder %s2545_s12, %s4807_s6  ;;  %p2536_p1 = scmp.ge.s32.totalorder %s2537_s17, %s4807_s6 }
 0x393   : >> { %s4924_s12 = smov (%p2546_p0, %s2545_s12), 0  ;;  %2539 = sbr.rel (!%p2536_p1) target bundleno = 912 (0x390), region = 133 }
 0x394   : >> { %s2802_s18 = sshll.u32 %s4924_s12, 3  ;;  %s3572_s14 = smov %s4924_s12  }
 0x395   : >> { %s2550_s11 = scalar_lea.vmem %s2531_s8, %s2802_s18 [#allocation2]   ;;  %s2551_s10 = scalar_lea.vmem %s2533_s9, %s2802_s18  }
 0x398 PF: > { %p10_p2 = scmp.ge.s32.totalorder %s3614_s16, 5   ;;  %s4916_s12 = smov %s3541_s13 }
 0x399   : > { %s4917_s13 = smov %s3622_s19  ;;  %s4918_s14 = smov %s3614_s16 }
 0x39a   :  { %12 = sbr.rel (!%p10_p2) target bundleno = 2 (0x2), region = 144 }

</bundles_post_ra>
